<compile_context>
chip_gen: v6e
topology: v6e:2x2x1
jax: 0.10.0
libtpu: 0.0.40
codegen_flags: <defaults>
</compile_context>

<pallas_src>
import jax
import jax.numpy as jnp
import numpy as np
from jax import lax
from jax.experimental import pallas as pl
from jax.experimental.pallas import tpu as pltpu

# ------------------------------------------------------------------
# "opt" configuration (hardcoded in-script, as parse_arguments would).
# ------------------------------------------------------------------
DIFF_TYPE = "fcode@tanh_fcode@relu"   # two FCODE blocks, tanh + relu
NUM_EULER_STEPS = 4                   # fixed-step Euler integration
ODE_T = 1.0                           # integrate t in [0, 1]


def _round_up(x, m):
    return (x + m - 1) // m * m


def _act_fn(name):
    if name == "tanh":
        return jnp.tanh
    if name == "relu":
        return lambda v: jnp.maximum(v, 0.0)
    raise NotImplementedError(name)


def _default_fuse(nb):
    """Block-diagonal fusion only pays off on 256x256-MXU chips (v6e/v7x)."""
    if nb < 2:
        return False
    try:
        kind = jax.devices()[0].device_kind.lower()
    except Exception:
        return False
    return ("v6" in kind) or ("v7" in kind)


def _const_spec(shape):
    """BlockSpec for grid-invariant operands; single-buffered when supported."""
    idx = lambda i: (0,) * len(shape)                     # noqa: E731
    try:
        return pl.BlockSpec(shape, idx, pipeline_mode=pl.Buffered(1))
    except TypeError:
        # Older jax without pipeline_mode: default (double-buffered) spec.
        return pl.BlockSpec(shape, idx)


# ------------------------------------------------------------------
# Kernels (activations / Euler steps / dtypes baked in statically).
# Grid: one "parallel" axis over row tiles of R = B*N.
# ------------------------------------------------------------------
def _make_unfused_kernel(act_names, num_steps, dt, compute_dtype):
    """One (TR,128)@(128,128) matmul pair per block per Euler step."""
    dt = float(dt)

    def kernel(z0_ref, w1_ref, b1_ref, w2_ref, b2_ref, out_ref):
        z0 = z0_ref[...].astype(jnp.float32)              # (TR, dim_p)

        # Static loop over FCODE blocks (list is known at trace time).
        for b, act in enumerate(act_names):
            w1 = w1_ref[b]                                # (dim_p, hid_p)
            w2 = w2_ref[b]                                # (hid_p, dim_p)
            b1 = b1_ref[b]                                # (1, hid_p)  f32
            b2dt = b2_ref[b] * dt                         # (1, dim_p)  f32
            act_fn = _act_fn(act)

            def euler_step(_, z, w1=w1, w2=w2, b1=b1, b2dt=b2dt, act_fn=act_fn):
                # bf16 (or f32) matmul operands, f32 accumulation and state.
                h = act_fn(jnp.dot(z.astype(compute_dtype), w1,
                                   preferred_element_type=jnp.float32) + b1)
                dz = jnp.dot(h.astype(compute_dtype), w2,
                             preferred_element_type=jnp.float32)
                return z + dt * dz + b2dt

            z = lax.fori_loop(0, num_steps, euler_step, z0, unroll=True)

            # Accumulate directly into the VMEM-resident output tile.
            # (out dtype is f32 here; use a VMEM scratch if it becomes bf16.)
            if b == 0:
                out_ref[...] = z.astype(out_ref.dtype)
            else:
                out_ref[...] = out_ref[...] + z.astype(out_ref.dtype)

    return kernel


def _make_fused_kernel(act_names, num_steps, dt, compute_dtype, dim_p, hid_p):
    """Both blocks as one block-diagonal K=N=nb*128 matmul per Euler step."""
    nb = len(act_names)
    dt = float(dt)

    def act_apply(h):
        parts = []
        for b, act in enumerate(act_names):
            hb = h[:, b * hid_p:(b + 1) * hid_p]          # tile-aligned lane slice
            parts.append(_act_fn(act)(hb))
        return jnp.concatenate(parts, axis=-1)

    def kernel(z0_ref, w1_ref, b1_ref, w2_ref, b2_ref, out_ref):
        z0 = z0_ref[...].astype(jnp.float32)              # (TR, dim_p)
        z = jnp.concatenate([z0] * nb, axis=-1)           # (TR, nb*dim_p)

        w1 = w1_ref[...]                                  # (nb*dim_p, nb*hid_p)
        w2 = w2_ref[...]                                  # (nb*hid_p, nb*dim_p)
        b1 = b1_ref[...]                                  # (1, nb*hid_p)  f32
        b2dt = b2_ref[...] * dt                           # (1, nb*dim_p)  f32

        def euler_step(_, z):
            h = act_apply(jnp.dot(z.astype(compute_dtype), w1,
                                  preferred_element_type=jnp.float32) + b1)
            dz = jnp.dot(h.astype(compute_dtype), w2,
                         preferred_element_type=jnp.float32)
            return z + dt * dz + b2dt

        z = lax.fori_loop(0, num_steps, euler_step, z, unroll=True)

        acc = z[:, 0:dim_p]
        for b in range(1, nb):
            acc = acc + z[:, b * dim_p:(b + 1) * dim_p]
        out_ref[...] = acc.astype(out_ref.dtype)

    return kernel


# ------------------------------------------------------------------
# One-time weight preparation: padding / fusion / dtype, done at init.
# ------------------------------------------------------------------
def prepare_diffblock_params(params, act_names, *, fuse_blocks=None,
                             use_bf16=False):
    nb, dim, hidden = params["w1"].shape
    assert nb == len(act_names)
    dim_p = _round_up(dim, 128)
    hid_p = _round_up(hidden, 128)
    if fuse_blocks is None:
        fuse_blocks = _default_fuse(nb)
    w_dtype = jnp.bfloat16 if use_bf16 else jnp.float32

    if fuse_blocks:
        # Block-diagonal packing: one matmul per Euler step fills a
        # 256x256 MXU (v6e/v7x).  Zero off-diagonal blocks keep the math exact.
        w1 = jnp.zeros((nb * dim_p, nb * hid_p), w_dtype)
        w2 = jnp.zeros((nb * hid_p, nb * dim_p), w_dtype)
        b1 = jnp.zeros((1, nb * hid_p), jnp.float32)
        b2 = jnp.zeros((1, nb * dim_p), jnp.float32)
        for b in range(nb):
            w1 = w1.at[b * dim_p:b * dim_p + dim,
                       b * hid_p:b * hid_p + hidden].set(
                params["w1"][b].astype(w_dtype))
            w2 = w2.at[b * hid_p:b * hid_p + hidden,
                       b * dim_p:b * dim_p + dim].set(
                params["w2"][b].astype(w_dtype))
            b1 = b1.at[:, b * hid_p:b * hid_p + hidden].set(params["b1"][b])
            b2 = b2.at[:, b * dim_p:b * dim_p + dim].set(params["b2"][b])
    else:
        w1 = jnp.zeros((nb, dim_p, hid_p), w_dtype).at[:, :dim, :hidden].set(
            params["w1"].astype(w_dtype))
        b1 = jnp.zeros((nb, 1, hid_p), jnp.float32).at[:, :, :hidden].set(
            params["b1"])
        w2 = jnp.zeros((nb, hid_p, dim_p), w_dtype).at[:, :hidden, :dim].set(
            params["w2"].astype(w_dtype))
        b2 = jnp.zeros((nb, 1, dim_p), jnp.float32).at[:, :, :dim].set(
            params["b2"])

    w1, b1, w2, b2 = jax.block_until_ready((w1, b1, w2, b2))
    return dict(w1=w1, b1=b1, w2=w2, b2=b2,
                act_names=tuple(act_names), nb=nb, dim=dim, hidden=hidden,
                dim_p=dim_p, hid_p=hid_p, fused=bool(fuse_blocks),
                compute_dtype=w_dtype)


# ------------------------------------------------------------------
# Wrapper ("DiffBlock.forward")
# ------------------------------------------------------------------
def diffblock_forward(x, prepared, z0=None, *, tile_rows=512):
    """x: (B, N, dim).  prepared: output of prepare_diffblock_params.  z0 optional."""
    B, N, dim = x.shape
    assert dim == prepared["dim"]
    R = B * N
    dim_p, hid_p, nb = prepared["dim_p"], prepared["hid_p"], prepared["nb"]

    # Row tiling: TR multiple of 8; ensure >= 2 row tiles when possible so the
    # "parallel" grid axis actually shards across v7x's two TensorCores.
    R8 = _round_up(R, 8)
    TR = min(tile_rows, R8)
    if R8 > 8 and R8 <= TR:
        TR = _round_up((R8 + 1) // 2, 8)
    R_pad = _round_up(R, TR)

    # TODO(synk): at tiny R this per-call z padding + output slice dominates;
    # for production R the kernel is MXU-bound and this wrapper cost is noise.
    init = (x if z0 is None else z0).reshape(R, dim)
    z_p = jnp.zeros((R_pad, dim_p), init.dtype).at[:R, :dim].set(init)

    dt = ODE_T / NUM_EULER_STEPS
    if prepared["fused"]:
        kernel = _make_fused_kernel(prepared["act_names"], NUM_EULER_STEPS, dt,
                                    prepared["compute_dtype"], dim_p, hid_p)
        w_specs = [
            _const_spec((nb * dim_p, nb * hid_p)),   # block-diag W1
            _const_spec((1, nb * hid_p)),            # b1
            _const_spec((nb * hid_p, nb * dim_p)),   # block-diag W2
            _const_spec((1, nb * dim_p)),            # b2
        ]
    else:
        kernel = _make_unfused_kernel(prepared["act_names"], NUM_EULER_STEPS,
                                      dt, prepared["compute_dtype"])
        w_specs = [
            _const_spec((nb, dim_p, hid_p)),         # W1 (all blocks)
            _const_spec((nb, 1, hid_p)),             # b1
            _const_spec((nb, hid_p, dim_p)),         # W2
            _const_spec((nb, 1, dim_p)),             # b2
        ]

    out_p = pl.pallas_call(
        kernel,
        out_shape=jax.ShapeDtypeStruct((R_pad, dim_p), x.dtype),
        grid=(R_pad // TR,),
        in_specs=[pl.BlockSpec((TR, dim_p), lambda i: (i, 0))] + w_specs,
        out_specs=pl.BlockSpec((TR, dim_p), lambda i: (i, 0)),
        compiler_params=pltpu.CompilerParams(
            dimension_semantics=("parallel",)),
    )(z_p, prepared["w1"], prepared["b1"], prepared["w2"], prepared["b2"])

    return out_p[:R, :dim].reshape(B, N, dim)


# ------------------------------------------------------------------
# Deterministic parameter init for each FCODE block (stacked on axis 0).
# ------------------------------------------------------------------
def init_diffblock_params(key, dim, hidden, num_blocks):
    ks = jax.random.split(key, 4)
    s1 = 1.0 / np.sqrt(dim)
    s2 = 1.0 / np.sqrt(hidden)
    return {
        "w1": jax.random.uniform(ks[0], (num_blocks, dim, hidden), jnp.float32, -s1, s1),
        "b1": jax.random.uniform(ks[1], (num_blocks, 1, hidden), jnp.float32, -s1, s1),
        "w2": jax.random.uniform(ks[2], (num_blocks, hidden, dim), jnp.float32, -s2, s2),
        "b2": jax.random.uniform(ks[3], (num_blocks, 1, dim), jnp.float32, -s2, s2),
    }


# ------------------------------------------------------------------
# Pure-JAX reference (mirrors DiffBlock.forward: sum over FCODE blocks).
# ------------------------------------------------------------------
def diffblock_reference(x, params, act_names, z0=None):
    B, N, dim = x.shape
    z_init = (x if z0 is None else z0).reshape(B * N, dim).astype(jnp.float32)
    dt = ODE_T / NUM_EULER_STEPS
    outs = []
    for i, a in enumerate(act_names):
        act = _act_fn(a)
        z = z_init
        for _ in range(NUM_EULER_STEPS):
            h = act(z @ params["w1"][i] + params["b1"][i])
            z = z + dt * (h @ params["w2"][i] + params["b2"][i])
        outs.append(z)
    return sum(outs).reshape(B, N, dim).astype(x.dtype)


# ------------------------------------------------------------------
if __name__ == "__main__":
    # Parse diff_type exactly like the module does.
    act_names = []
    for e in DIFF_TYPE.split("_"):
        name, act = e.split("@")
        assert name == "fcode", "only fcode is implemented"
        act_names.append(act)

    # Small shapes: batch=2, seq=8, dim=32, ode hidden width=32.
    B, N, dim, hidden = 2, 8, 32, 32

    key = jax.random.PRNGKey(0)
    kx, kp = jax.random.split(key)
    x = jax.random.normal(kx, (B, N, dim), jnp.float32)
    params = init_diffblock_params(kp, dim, hidden, len(act_names))
    ref = diffblock_reference(x, params, act_names)

    # 1) f32 operands, per-block matmuls (native width on v5e; runs everywhere).
    prep_sep = prepare_diffblock_params(params, act_names,
                                        fuse_blocks=False, use_bf16=False)
    out = jax.block_until_ready(diffblock_forward(x, prep_sep))   # z0=None path
    np.testing.assert_allclose(np.asarray(out), np.asarray(ref),
                               rtol=1e-5, atol=1e-5)

    # 2) f32 operands, block-diagonal fusion (fills v6e/v7x 256x256 MXU).
    #    Mathematically identical (zero off-diagonal blocks), so same tolerance.
    if len(act_names) == 2:
        prep_fused = prepare_diffblock_params(params, act_names,
                                              fuse_blocks=True, use_bf16=False)
        out_f = jax.block_until_ready(diffblock_forward(x, prep_fused))
        np.testing.assert_allclose(np.asarray(out_f), np.asarray(ref),
                                   rtol=1e-5, atol=1e-5)

    # 3) bf16 matmul operands + f32 accumulation/state (gated, looser tolerance).
    prep_bf16 = prepare_diffblock_params(params, act_names, use_bf16=True)
    out_b = jax.block_until_ready(diffblock_forward(x, prep_bf16))
    np.testing.assert_allclose(np.asarray(out_b), np.asarray(ref),
                               rtol=2e-2, atol=2e-2)

    print("KERNEL_OK")
</pallas_src>

<mosaic_0001>
module attributes {stable_mosaic.version = 11 : i64} {
  func.func @kernel(%arg0: i32, %arg1: memref<8x128xf32, #tpu.memory_space<vmem>>, %arg2: memref<2x128x128xf32, #tpu.memory_space<vmem>>, %arg3: memref<2x1x128xf32, #tpu.memory_space<vmem>>, %arg4: memref<2x128x128xf32, #tpu.memory_space<vmem>>, %arg5: memref<2x1x128xf32, #tpu.memory_space<vmem>>, %arg6: memref<8x128xf32, #tpu.memory_space<vmem>>) attributes {dimension_semantics = [#tpu.dimension_semantics<parallel>], iteration_bounds = array<i64: 2>, scalar_prefetch = 0 : i64, scratch_operands = 0 : i64, tpu.core_type = #tpu.core_type<tc>, window_params = [{transform_indices = @transform_0, window_bounds = array<i64: 8, 128>}, {pipeline_mode = #tpu.pipeline_mode<synchronous>, transform_indices = @transform_1, window_bounds = array<i64: 2, 128, 128>}, {pipeline_mode = #tpu.pipeline_mode<synchronous>, transform_indices = @transform_2, window_bounds = array<i64: 2, 1, 128>}, {pipeline_mode = #tpu.pipeline_mode<synchronous>, transform_indices = @transform_3, window_bounds = array<i64: 2, 128, 128>}, {pipeline_mode = #tpu.pipeline_mode<synchronous>, transform_indices = @transform_4, window_bounds = array<i64: 2, 1, 128>}, {transform_indices = @transform_5, window_bounds = array<i64: 8, 128>}]} {
    %c0 = arith.constant 0 : index
    %c0_0 = arith.constant 0 : index
    %0 = vector.load %arg1[%c0, %c0_0] : memref<8x128xf32, #tpu.memory_space<vmem>>, vector<8x128xf32>
    %c0_1 = arith.constant 0 : index
    %c0_2 = arith.constant 0 : index
    %c0_3 = arith.constant 0 : index
    %1 = vector.load %arg2[%c0_1, %c0_2, %c0_3] : memref<2x128x128xf32, #tpu.memory_space<vmem>>, vector<1x128x128xf32>
    %2 = vector.shape_cast %1 : vector<1x128x128xf32> to vector<128x128xf32>
    %c0_4 = arith.constant 0 : index
    %c0_5 = arith.constant 0 : index
    %c0_6 = arith.constant 0 : index
    %3 = vector.load %arg4[%c0_4, %c0_5, %c0_6] : memref<2x128x128xf32, #tpu.memory_space<vmem>>, vector<1x128x128xf32>
    %4 = vector.shape_cast %3 : vector<1x128x128xf32> to vector<128x128xf32>
    %c0_7 = arith.constant 0 : index
    %c0_8 = arith.constant 0 : index
    %c0_9 = arith.constant 0 : index
    %5 = vector.load %arg3[%c0_7, %c0_8, %c0_9] : memref<2x1x128xf32, #tpu.memory_space<vmem>>, vector<1x1x128xf32>
    %6 = vector.shape_cast %5 : vector<1x1x128xf32> to vector<1x128xf32>
    %c0_10 = arith.constant 0 : index
    %c0_11 = arith.constant 0 : index
    %c0_12 = arith.constant 0 : index
    %7 = vector.load %arg5[%c0_10, %c0_11, %c0_12] : memref<2x1x128xf32, #tpu.memory_space<vmem>>, vector<1x1x128xf32>
    %8 = vector.shape_cast %7 : vector<1x1x128xf32> to vector<1x128xf32>
    %cst = arith.constant 2.500000e-01 : f32
    %9 = vector.broadcast %cst : f32 to vector<1x128xf32>
    %10 = arith.mulf %8, %9 : vector<1x128xf32>
    %c0_i32 = arith.constant 0 : i32
    %cst_13 = arith.constant dense<0.000000e+00> : vector<8x128xf32>
    %11 = tpu.matmul %0, %2, %cst_13 {dimension_numbers = #tpu.dot_dimension_numbers<[1], [0], [0], [1], [0, 0, 1, 1], [], []>} : vector<8x128xf32>, vector<128x128xf32>, vector<8x128xf32> -> vector<8x128xf32>
    %12 = vector.broadcast %6 : vector<1x128xf32> to vector<8x128xf32>
    %13 = arith.addf %11, %12 : vector<8x128xf32>
    %14 = math.tanh %13 : vector<8x128xf32>
    %cst_14 = arith.constant dense<0.000000e+00> : vector<8x128xf32>
    %15 = tpu.matmul %14, %4, %cst_14 {dimension_numbers = #tpu.dot_dimension_numbers<[1], [0], [0], [1], [0, 0, 1, 1], [], []>} : vector<8x128xf32>, vector<128x128xf32>, vector<8x128xf32> -> vector<8x128xf32>
    %cst_15 = arith.constant 2.500000e-01 : f32
    %16 = vector.broadcast %cst_15 : f32 to vector<8x128xf32>
    %17 = arith.mulf %16, %15 : vector<8x128xf32>
    %18 = arith.addf %0, %17 : vector<8x128xf32>
    %19 = vector.broadcast %10 : vector<1x128xf32> to vector<8x128xf32>
    %20 = arith.addf %18, %19 : vector<8x128xf32>
    %c1_i32 = arith.constant 1 : i32
    %cst_16 = arith.constant dense<0.000000e+00> : vector<8x128xf32>
    %21 = tpu.matmul %20, %2, %cst_16 {dimension_numbers = #tpu.dot_dimension_numbers<[1], [0], [0], [1], [0, 0, 1, 1], [], []>} : vector<8x128xf32>, vector<128x128xf32>, vector<8x128xf32> -> vector<8x128xf32>
    %22 = vector.broadcast %6 : vector<1x128xf32> to vector<8x128xf32>
    %23 = arith.addf %21, %22 : vector<8x128xf32>
    %24 = math.tanh %23 : vector<8x128xf32>
    %cst_17 = arith.constant dense<0.000000e+00> : vector<8x128xf32>
    %25 = tpu.matmul %24, %4, %cst_17 {dimension_numbers = #tpu.dot_dimension_numbers<[1], [0], [0], [1], [0, 0, 1, 1], [], []>} : vector<8x128xf32>, vector<128x128xf32>, vector<8x128xf32> -> vector<8x128xf32>
    %cst_18 = arith.constant 2.500000e-01 : f32
    %26 = vector.broadcast %cst_18 : f32 to vector<8x128xf32>
    %27 = arith.mulf %26, %25 : vector<8x128xf32>
    %28 = arith.addf %20, %27 : vector<8x128xf32>
    %29 = vector.broadcast %10 : vector<1x128xf32> to vector<8x128xf32>
    %30 = arith.addf %28, %29 : vector<8x128xf32>
    %c2_i32 = arith.constant 2 : i32
    %cst_19 = arith.constant dense<0.000000e+00> : vector<8x128xf32>
    %31 = tpu.matmul %30, %2, %cst_19 {dimension_numbers = #tpu.dot_dimension_numbers<[1], [0], [0], [1], [0, 0, 1, 1], [], []>} : vector<8x128xf32>, vector<128x128xf32>, vector<8x128xf32> -> vector<8x128xf32>
    %32 = vector.broadcast %6 : vector<1x128xf32> to vector<8x128xf32>
    %33 = arith.addf %31, %32 : vector<8x128xf32>
    %34 = math.tanh %33 : vector<8x128xf32>
    %cst_20 = arith.constant dense<0.000000e+00> : vector<8x128xf32>
    %35 = tpu.matmul %34, %4, %cst_20 {dimension_numbers = #tpu.dot_dimension_numbers<[1], [0], [0], [1], [0, 0, 1, 1], [], []>} : vector<8x128xf32>, vector<128x128xf32>, vector<8x128xf32> -> vector<8x128xf32>
    %cst_21 = arith.constant 2.500000e-01 : f32
    %36 = vector.broadcast %cst_21 : f32 to vector<8x128xf32>
    %37 = arith.mulf %36, %35 : vector<8x128xf32>
    %38 = arith.addf %30, %37 : vector<8x128xf32>
    %39 = vector.broadcast %10 : vector<1x128xf32> to vector<8x128xf32>
    %40 = arith.addf %38, %39 : vector<8x128xf32>
    %c3_i32 = arith.constant 3 : i32
    %cst_22 = arith.constant dense<0.000000e+00> : vector<8x128xf32>
    %41 = tpu.matmul %40, %2, %cst_22 {dimension_numbers = #tpu.dot_dimension_numbers<[1], [0], [0], [1], [0, 0, 1, 1], [], []>} : vector<8x128xf32>, vector<128x128xf32>, vector<8x128xf32> -> vector<8x128xf32>
    %42 = vector.broadcast %6 : vector<1x128xf32> to vector<8x128xf32>
    %43 = arith.addf %41, %42 : vector<8x128xf32>
    %44 = math.tanh %43 : vector<8x128xf32>
    %cst_23 = arith.constant dense<0.000000e+00> : vector<8x128xf32>
    %45 = tpu.matmul %44, %4, %cst_23 {dimension_numbers = #tpu.dot_dimension_numbers<[1], [0], [0], [1], [0, 0, 1, 1], [], []>} : vector<8x128xf32>, vector<128x128xf32>, vector<8x128xf32> -> vector<8x128xf32>
    %cst_24 = arith.constant 2.500000e-01 : f32
    %46 = vector.broadcast %cst_24 : f32 to vector<8x128xf32>
    %47 = arith.mulf %46, %45 : vector<8x128xf32>
    %48 = arith.addf %40, %47 : vector<8x128xf32>
    %49 = vector.broadcast %10 : vector<1x128xf32> to vector<8x128xf32>
    %50 = arith.addf %48, %49 : vector<8x128xf32>
    %c0_25 = arith.constant 0 : index
    %c0_26 = arith.constant 0 : index
    %51 = vector.load %arg6[%c0_25, %c0_26] : memref<8x128xf32, #tpu.memory_space<vmem>>, vector<8x128xf32>
    tpu.vector_store %arg6[%c0_25, %c0_26], %50 {strides = array<i32>} : memref<8x128xf32, #tpu.memory_space<vmem>>, vector<8x128xf32>,
    %c1 = arith.constant 1 : index
    %c0_27 = arith.constant 0 : index
    %c0_28 = arith.constant 0 : index
    %52 = vector.load %arg2[%c1, %c0_27, %c0_28] : memref<2x128x128xf32, #tpu.memory_space<vmem>>, vector<1x128x128xf32>
    %53 = vector.shape_cast %52 : vector<1x128x128xf32> to vector<128x128xf32>
    %c1_29 = arith.constant 1 : index
    %c0_30 = arith.constant 0 : index
    %c0_31 = arith.constant 0 : index
    %54 = vector.load %arg4[%c1_29, %c0_30, %c0_31] : memref<2x128x128xf32, #tpu.memory_space<vmem>>, vector<1x128x128xf32>
    %55 = vector.shape_cast %54 : vector<1x128x128xf32> to vector<128x128xf32>
    %c1_32 = arith.constant 1 : index
    %c0_33 = arith.constant 0 : index
    %c0_34 = arith.constant 0 : index
    %56 = vector.load %arg3[%c1_32, %c0_33, %c0_34] : memref<2x1x128xf32, #tpu.memory_space<vmem>>, vector<1x1x128xf32>
    %57 = vector.shape_cast %56 : vector<1x1x128xf32> to vector<1x128xf32>
    %c1_35 = arith.constant 1 : index
    %c0_36 = arith.constant 0 : index
    %c0_37 = arith.constant 0 : index
    %58 = vector.load %arg5[%c1_35, %c0_36, %c0_37] : memref<2x1x128xf32, #tpu.memory_space<vmem>>, vector<1x1x128xf32>
    %59 = vector.shape_cast %58 : vector<1x1x128xf32> to vector<1x128xf32>
    %cst_38 = arith.constant 2.500000e-01 : f32
    %60 = vector.broadcast %cst_38 : f32 to vector<1x128xf32>
    %61 = arith.mulf %59, %60 : vector<1x128xf32>
    %c0_i32_39 = arith.constant 0 : i32
    %cst_40 = arith.constant dense<0.000000e+00> : vector<8x128xf32>
    %62 = tpu.matmul %0, %53, %cst_40 {dimension_numbers = #tpu.dot_dimension_numbers<[1], [0], [0], [1], [0, 0, 1, 1], [], []>} : vector<8x128xf32>, vector<128x128xf32>, vector<8x128xf32> -> vector<8x128xf32>
    %63 = vector.broadcast %57 : vector<1x128xf32> to vector<8x128xf32>
    %64 = arith.addf %62, %63 : vector<8x128xf32>
    %cst_41 = arith.constant 0.000000e+00 : f32
    %65 = vector.broadcast %cst_41 : f32 to vector<8x128xf32>
    %66 = arith.maximumf %64, %65 : vector<8x128xf32>
    %cst_42 = arith.constant dense<0.000000e+00> : vector<8x128xf32>
    %67 = tpu.matmul %66, %55, %cst_42 {dimension_numbers = #tpu.dot_dimension_numbers<[1], [0], [0], [1], [0, 0, 1, 1], [], []>} : vector<8x128xf32>, vector<128x128xf32>, vector<8x128xf32> -> vector<8x128xf32>
    %cst_43 = arith.constant 2.500000e-01 : f32
    %68 = vector.broadcast %cst_43 : f32 to vector<8x128xf32>
    %69 = arith.mulf %68, %67 : vector<8x128xf32>
    %70 = arith.addf %0, %69 : vector<8x128xf32>
    %71 = vector.broadcast %61 : vector<1x128xf32> to vector<8x128xf32>
    %72 = arith.addf %70, %71 : vector<8x128xf32>
    %c1_i32_44 = arith.constant 1 : i32
    %cst_45 = arith.constant dense<0.000000e+00> : vector<8x128xf32>
    %73 = tpu.matmul %72, %53, %cst_45 {dimension_numbers = #tpu.dot_dimension_numbers<[1], [0], [0], [1], [0, 0, 1, 1], [], []>} : vector<8x128xf32>, vector<128x128xf32>, vector<8x128xf32> -> vector<8x128xf32>
    %74 = vector.broadcast %57 : vector<1x128xf32> to vector<8x128xf32>
    %75 = arith.addf %73, %74 : vector<8x128xf32>
    %cst_46 = arith.constant 0.000000e+00 : f32
    %76 = vector.broadcast %cst_46 : f32 to vector<8x128xf32>
    %77 = arith.maximumf %75, %76 : vector<8x128xf32>
    %cst_47 = arith.constant dense<0.000000e+00> : vector<8x128xf32>
    %78 = tpu.matmul %77, %55, %cst_47 {dimension_numbers = #tpu.dot_dimension_numbers<[1], [0], [0], [1], [0, 0, 1, 1], [], []>} : vector<8x128xf32>, vector<128x128xf32>, vector<8x128xf32> -> vector<8x128xf32>
    %cst_48 = arith.constant 2.500000e-01 : f32
    %79 = vector.broadcast %cst_48 : f32 to vector<8x128xf32>
    %80 = arith.mulf %79, %78 : vector<8x128xf32>
    %81 = arith.addf %72, %80 : vector<8x128xf32>
    %82 = vector.broadcast %61 : vector<1x128xf32> to vector<8x128xf32>
    %83 = arith.addf %81, %82 : vector<8x128xf32>
    %c2_i32_49 = arith.constant 2 : i32
    %cst_50 = arith.constant dense<0.000000e+00> : vector<8x128xf32>
    %84 = tpu.matmul %83, %53, %cst_50 {dimension_numbers = #tpu.dot_dimension_numbers<[1], [0], [0], [1], [0, 0, 1, 1], [], []>} : vector<8x128xf32>, vector<128x128xf32>, vector<8x128xf32> -> vector<8x128xf32>
    %85 = vector.broadcast %57 : vector<1x128xf32> to vector<8x128xf32>
    %86 = arith.addf %84, %85 : vector<8x128xf32>
    %cst_51 = arith.constant 0.000000e+00 : f32
    %87 = vector.broadcast %cst_51 : f32 to vector<8x128xf32>
    %88 = arith.maximumf %86, %87 : vector<8x128xf32>
    %cst_52 = arith.constant dense<0.000000e+00> : vector<8x128xf32>
    %89 = tpu.matmul %88, %55, %cst_52 {dimension_numbers = #tpu.dot_dimension_numbers<[1], [0], [0], [1], [0, 0, 1, 1], [], []>} : vector<8x128xf32>, vector<128x128xf32>, vector<8x128xf32> -> vector<8x128xf32>
    %cst_53 = arith.constant 2.500000e-01 : f32
    %90 = vector.broadcast %cst_53 : f32 to vector<8x128xf32>
    %91 = arith.mulf %90, %89 : vector<8x128xf32>
    %92 = arith.addf %83, %91 : vector<8x128xf32>
    %93 = vector.broadcast %61 : vector<1x128xf32> to vector<8x128xf32>
    %94 = arith.addf %92, %93 : vector<8x128xf32>
    %c3_i32_54 = arith.constant 3 : i32
    %cst_55 = arith.constant dense<0.000000e+00> : vector<8x128xf32>
    %95 = tpu.matmul %94, %53, %cst_55 {dimension_numbers = #tpu.dot_dimension_numbers<[1], [0], [0], [1], [0, 0, 1, 1], [], []>} : vector<8x128xf32>, vector<128x128xf32>, vector<8x128xf32> -> vector<8x128xf32>
    %96 = vector.broadcast %57 : vector<1x128xf32> to vector<8x128xf32>
    %97 = arith.addf %95, %96 : vector<8x128xf32>
    %cst_56 = arith.constant 0.000000e+00 : f32
    %98 = vector.broadcast %cst_56 : f32 to vector<8x128xf32>
    %99 = arith.maximumf %97, %98 : vector<8x128xf32>
    %cst_57 = arith.constant dense<0.000000e+00> : vector<8x128xf32>
    %100 = tpu.matmul %99, %55, %cst_57 {dimension_numbers = #tpu.dot_dimension_numbers<[1], [0], [0], [1], [0, 0, 1, 1], [], []>} : vector<8x128xf32>, vector<128x128xf32>, vector<8x128xf32> -> vector<8x128xf32>
    %cst_58 = arith.constant 2.500000e-01 : f32
    %101 = vector.broadcast %cst_58 : f32 to vector<8x128xf32>
    %102 = arith.mulf %101, %100 : vector<8x128xf32>
    %103 = arith.addf %94, %102 : vector<8x128xf32>
    %104 = vector.broadcast %61 : vector<1x128xf32> to vector<8x128xf32>
    %105 = arith.addf %103, %104 : vector<8x128xf32>
    %c0_59 = arith.constant 0 : index
    %c0_60 = arith.constant 0 : index
    %106 = vector.load %arg6[%c0_59, %c0_60] : memref<8x128xf32, #tpu.memory_space<vmem>>, vector<8x128xf32>
    %107 = arith.addf %106, %105 : vector<8x128xf32>
    %c0_61 = arith.constant 0 : index
    %c0_62 = arith.constant 0 : index
    %108 = vector.load %arg6[%c0_61, %c0_62] : memref<8x128xf32, #tpu.memory_space<vmem>>, vector<8x128xf32>
    tpu.vector_store %arg6[%c0_61, %c0_62], %107 {strides = array<i32>} : memref<8x128xf32, #tpu.memory_space<vmem>>, vector<8x128xf32>,
    return
  }
  func.func @transform_0(%arg0: i32) -> (i32, i32) {
    %c0_i32 = arith.constant 0 : i32
    %c0_i32_0 = arith.constant 0 : i32
    return %arg0, %c0_i32 : i32, i32
  }
  func.func @transform_1(%arg0: i32) -> (i32, i32, i32) {
    %c0_i32 = arith.constant 0 : i32
    %c0_i32_0 = arith.constant 0 : i32
    %c0_i32_1 = arith.constant 0 : i32
    %c0_i32_2 = arith.constant 0 : i32
    return %c0_i32, %c0_i32_0, %c0_i32_1 : i32, i32, i32
  }
  func.func @transform_2(%arg0: i32) -> (i32, i32, i32) {
    %c0_i32 = arith.constant 0 : i32
    %c0_i32_0 = arith.constant 0 : i32
    %c0_i32_1 = arith.constant 0 : i32
    %c0_i32_2 = arith.constant 0 : i32
    return %c0_i32, %c0_i32_0, %c0_i32_1 : i32, i32, i32
  }
  func.func @transform_3(%arg0: i32) -> (i32, i32, i32) {
    %c0_i32 = arith.constant 0 : i32
    %c0_i32_0 = arith.constant 0 : i32
    %c0_i32_1 = arith.constant 0 : i32
    %c0_i32_2 = arith.constant 0 : i32
    return %c0_i32, %c0_i32_0, %c0_i32_1 : i32, i32, i32
  }
  func.func @transform_4(%arg0: i32) -> (i32, i32, i32) {
    %c0_i32 = arith.constant 0 : i32
    %c0_i32_0 = arith.constant 0 : i32
    %c0_i32_1 = arith.constant 0 : i32
    %c0_i32_2 = arith.constant 0 : i32
    return %c0_i32, %c0_i32_0, %c0_i32_1 : i32, i32, i32
  }
  func.func @transform_5(%arg0: i32) -> (i32, i32) {
    %c0_i32 = arith.constant 0 : i32
    %c0_i32_0 = arith.constant 0 : i32
    return %arg0, %c0_i32 : i32, i32
  }
}

</mosaic_0001>

<bundles_post_ra>
// kernel: tpu_custom_call.1
= control target key start
LH: loop header
LB: loop body
LE: loop exit
PB: predicated region body
PF: predicated region fallthrough
CT: control target
= control target key end

     0   :  { %10 = vsyncpa [#allocation3], 0  ;;  %s3662_s0 = inlined_call_operand.hbm [shape: f32[16,128], index: 0, kind: input, shape index: {}]   ;;  %s3663_s1 = inlined_call_operand.hbm [shape: f32[2,128,128], index: 1, kind: input, shape index: {}]   ;;  %s3664_s2 = inlined_call_operand.vmem [shape: f32[2,1,128], index: 2, kind: input, shape index: {}]   ;;  %s3665_s3 = inlined_call_operand.hbm [shape: f32[2,128,128], index: 3, kind: input, shape index: {}]   ;;  %s3666_s4 = inlined_call_operand.vmem [shape: f32[2,1,128], index: 4, kind: input, shape index: {}]   ;;  %s3667_s5 = inlined_call_operand.hbm [shape: f32[16,128], index: 5, kind: output, shape index: {}]  }
   0x1   :  { %12 = vsyncpa [#allocation3 + $0x1], 0 }
   0x2   :  { %13 = vsyncpa [#allocation6], 0 }
   0x3   :  { %14 = vsyncpa [#allocation4], 0 }
   0x4   :  { %16 = vsyncpa [#allocation4 + $0x1], 0  ;;  %s2746_s18 = smov 0   ;;  %s2748_s19 = smov 0  }
   0x5   :  { %s2750_s20 = smov 0   ;;  %s2752_s21 = smov 0  }
   0x6 LB: > { %s2767_s22 = sadd.s32 4294967295, %s2706_s21   ;;  %s1627_s23 = sadd.s32 4294967294, %s2706_s21   ;;  %s2706_s21 = sphi %s2752_s21, %s3689_s21   ;;  %s2702_s20 = sphi %s2750_s20, %s3688_s20   ;;  %s2698_s19 = sphi %s2748_s19, %s3687_s19   ;;  %s2694_s18 = sphi %s2746_s18, %s3686_s18  }
   0x7   : > { %p42_p0 = scmp.ne.s32.totalorder %s2698_s19, %s2694_s18  ;;  %p3668_p1 = scmp.eq.s32.totalorder %s2767_s22, 0 }
   0x8   : > { %p156_p3 = scmp.eq.s32.totalorder %s1627_s23, 1  ;;  %p1628_p5 = scmp.ge.s32.totalorder %s2706_s21, 1 }
   0x9   : > { %p2776_p4 = por %p3668_p1, %p42_p0  ;;  %p163_p7 = scmp.lt.s32.totalorder %s2706_s21, 3 }
   0xa   : > { %p2781_p6 = por %p156_p3, %p42_p0  ;;  %s2708_s27 = smov [#allocation5]  }
   0xb   : > { %s3672_s24 = scalar_select %p2776_p4, 1, 0 }
   0xc   : > { %s3673_s25 = scalar_select %p2781_p6, 1, 0 }
   0xd   : > { %p2786_p8 = pnand %p1628_p5, %p163_p7  ;;  %s175_s28 = sshll.u32 %s2708_s27, 4  ;;  %s176_s28 = int_to_ptr.vmem [resolvable:$true] %s175_s28 }
   0xe   : > { %s2709_s30 = smov [#allocation7]   ;;  %s2569_s7 = scalar_lea.vmem %s176_s28, 4096 }
   0xf   : > { %s3674_s26 = scalar_select %p2786_p8, 1, 0 }
  0x10   : > { %p2491_p9 = pneg %p2786_p8  ;;  %s191_s6 = sshll.u32 %s2709_s30, 4  ;;  %s192_s6 = int_to_ptr.vmem [resolvable:$true] %s191_s6 }
  0x11   : > { %p2570_p13 = scmp.ne.s32.totalorder %s176_s28, %s2569_s7  ;;  %p2577_p5 = scmp.lt.s32.totalorder %s176_s28, %s176_s28 }
  0x12   : > { %p2795_p11 = pnand %p2491_p9, %p3668_p1  ;;  %p2578_p7 = scmp.lt.s32.totalorder %s2569_s7, %s2569_s7 }
  0x14   : > { %p2560_p12 = pneg %p2795_p11  ;;  %p2579_p10 = por %p2578_p7, %p2577_p5 }
  0x16   : > { %p2572_p0 = pnand %p2570_p13, %p2560_p12 }
  0x18   : > { %p2573_p3 = pneg %p2572_p0 }
  0x1a   : > { %p2580_p9 = pnand %p2579_p10, %p2573_p3 }
  0x1c   : > { %2583 = shalt.err (!%p2580_p9)
}
  0x1d   : > { %s2710_s8 = smov 128   ;;  %s2711_s9 = smov 8  }
  0x1e   : > { %2494 = dma.hbm_to_vmem [thread:$0]  (!%p2795_p11), %s3663_s1, 4096, %s176_s28, [#allocation6], %s2710_s8, %s2710_s8, %s2711_s9  }
  0x1f   : > { %s2595_s12 = scalar_lea.vmem %s192_s6, 4096  ;;  %p2603_p2 = scmp.lt.s32.totalorder %s192_s6, %s192_s6 }
  0x20   : > { %p2596_p1 = scmp.ne.s32.totalorder %s192_s6, %s2595_s12  ;;  %p2604_p6 = scmp.lt.s32.totalorder %s2595_s12, %s2595_s12 }
  0x22   : > { %p2598_p13 = pnand %p2596_p1, %p2560_p12  ;;  %p2605_p5 = por %p2604_p6, %p2603_p2 }
  0x24   : > { %p2599_p0 = pneg %p2598_p13 }
  0x26   : > { %p2606_p10 = pnand %p2605_p5, %p2599_p0 }
  0x28   : > { %2609 = shalt.err (!%p2606_p10)
}
  0x29   : > { %2497 = dma.hbm_to_vmem [thread:$0]  (!%p2795_p11), %s3665_s3, 4096, %s192_s6, [#allocation6], %s2710_s8, %s2710_s8, %s2711_s9  }
  0x2a   : > { %s2818_s15 = sadd.s32 1, %s2706_s21   ;;  %s29_s16 = sadd.s32 1, %s2702_s20 }
  0x2b   : > { %s26_s17 = ssub.s32 %s2706_s21, %s2818_s15  ;;  %p36_p1 = scmp.ne.s32.totalorder %s2702_s20, %s2698_s19 }
  0x2c   : > { %p27_p2 = scmp.eq.s32.totalorder %s26_s17, 0  ;;  %p37_p6 = scmp.eq.s32.totalorder %s2706_s21, 0 }
  0x2d   : > { %p3676_p12 = scmp.eq.s32.totalorder %s2767_s22, 1  ;;  %p2508_p7 = scmp.lt.s32.totalorder %s2706_s21, 2 }
  0x2e   : > { %s2834_s27 = scalar_select %p27_p2, %s2702_s20, %s29_s16  }
  0x2f   : > { %p2828_p3 = por %p3676_p12, %p36_p1  ;;  %p38_p9 = por %p37_p6, %p36_p1 }
  0x30   : > { %s208_s28 = sand.u32 1, %s2702_s20   ;;  %s1633_s30 = sshll.u32 %s2706_s21, 7 }
  0x31   : > { %s3677_s23 = scalar_select %p2828_p3, 1, 0 }
  0x32   : > { %s1632_s29 = sshll.u32 %s208_s28, 3  ;;  %s2841_s8 = scalar_lea.hbm %s3662_s0, %s1633_s30 }
  0x33   : > { %s212_s9 = scalar_lea.vmem [#allocation2], %s1632_s29  ;;  %p2843_p11 = pnand %p2508_p7, %p38_p9 }
  0x34   : > { %s219_s10 = sshll.u32 %s212_s9, 4  ;;  %s209_s12 = scalar_lea.sflag [#allocation3], %s208_s28  ;;  %s220_s10 = int_to_ptr.vmem [resolvable:$true] %s219_s10 }
  0x35   : > { %s2610_s13 = scalar_lea.hbm %s2841_s8, 128  ;;  %p2612_p0 = pneg %p2843_p11 }
  0x36   : > { %p2611_p13 = scmp.ne.s32.totalorder %s2841_s8, %s2610_s13  ;;  %s2615_s17 = scalar_lea.hbm %s3662_s0, 256 }
  0x37   : > { %p2616_p1 = scmp.lt.s32.totalorder %s2841_s8, %s3662_s0  ;;  %p2617_p2 = scmp.lt.s32.totalorder %s2615_s17, %s2610_s13 }
  0x38   : > { %p2613_p5 = pnand %p2612_p0, %p2611_p13 }
  0x39   : > { %p2618_p6 = por %p2617_p2, %p2616_p1 }
  0x3a   : > { %p2614_p10 = pneg %p2613_p5 }
  0x3c   : > { %p2619_p12 = pnand %p2618_p6, %p2614_p10 }
  0x3e   : > { %2622 = shalt.err (!%p2619_p12)
}
  0x3f   : > { %s2623_s6 = scalar_lea.vmem %s220_s10, 128  ;;  %s2712_s28 = smov [#allocation2]  }
  0x40   : > { %p2624_p7 = scmp.ne.s32.totalorder %s220_s10, %s2623_s6  ;;  %s2628_s7 = sshll.u32 %s2712_s28, 4  ;;  %s2629_s7 = int_to_ptr.vmem [resolvable:$false] %s2628_s7 }
  0x41   : > { %s2630_s9 = scalar_lea.vmem %s2629_s7, 256  ;;  %p2631_p13 = scmp.lt.s32.totalorder %s220_s10, %s2629_s7 }
  0x42   : > { %p2626_p9 = pnand %p2624_p7, %p2612_p0  ;;  %p2632_p5 = scmp.lt.s32.totalorder %s2630_s9, %s2623_s6 }
  0x44   : > { %p2627_p3 = pneg %p2626_p9  ;;  %p2633_p4 = por %p2632_p5, %p2631_p13 }
  0x46   : > { %p2634_p8 = pnand %p2633_p4, %p2627_p3 }
  0x48   : > { %2637 = shalt.err (!%p2634_p8)
}
  0x49   : > { %2501 = dma.hbm_to_vmem [thread:$0]  (!%p2843_p11), %s2841_s8, 128, %s220_s10, %s209_s12  }
  0x4a   : > { %p3679_p10 = scmp.ne.s32.totalorder %s3674_s26, 0 }
  0x4b   : > { %s2864_s13 = sand.u32 (!%p3679_p10), 1, %s2698_s19   ;;  %p3680_p4 = scmp.ne.s32.totalorder (!%p3679_p10), %s3672_s24, 0 }
  0x4c   : > { %228 = sbr.rel (%p3679_p10) target bundleno = 2986 (0xbaa), region = 40  ;;  %s1635_s14 = sshll.u32 (!%p3679_p10), %s2864_s13, 3 }
  0x4d   : > { %s231_s16 = scalar_lea.sflag (!%p3679_p10), [#allocation3], %s2864_s13  ;;  %s2870_s17 = scalar_lea.vmem (!%p3679_p10), [#allocation2], %s1635_s14 }
  0x51   : > { %2681 = dma.done.wait (%p3680_p4), %s231_s16, 128  }
  0x52   : > { %2683 = vsyncadd (%p3680_p4), %s231_s16, 4294967168  ;;  %p3681_p8 = scmp.eq.s32.totalorder %s2767_s22, 0 }
  0x54   : > { %2685 = dma.done.wait (%p3681_p8), [#allocation6], 8192   ;;  %p3682_p3 = pmov %p3681_p8 }
  0x55   : > { %v2713_v0 = vmov 0.0   ;;  %vm2714_vm0 = vmmov 0   ;;  %v2886_v1 = vld [vmem:[#allocation5 + $0x78] sm:$0xff]  ;;  %v2888_v2 = vld [vmem:[#allocation5 + $0x70] sm:$0xff]  ;;  %v2892_v3 = vld [vmem:[#allocation5 + $0x68] sm:$0xff]  ;;  %v455_v39 = vlaneseq  ;;  %s1644_s6 = sshll.u32 %s2767_s22, 7 }
  0x56   : > { %2687 = vsyncadd (%p3682_p3), [#allocation6], 4294959104  ;;  %1919 = vmatprep.subr.mxu0 %v2713_v0  ;;  %1951 = vmatprep.mubr.msk.f32.mxu0 %vm2714_vm0, %v2713_v0  ;;  %v2896_v4 = vld [vmem:[#allocation5 + $0x60] sm:$0xff]  ;;  %v2899_v5 = vld [vmem:[#allocation7 + $0x78] sm:$0xff]  ;;  %s268_s28 = scalar_lea.vmem [#allocation8], %s1635_s14  ;;  %s1525_s24 = scalar_lea.sflag [#allocation4], %s2864_s13 }
  0x57   : > { %1954 = vmatprep.subr.mxu1 %v2713_v0  ;;  %1986 = vmatprep.mubr.msk.f32.mxu1 %vm2714_vm0, %v2713_v0  ;;  %v2902_v6 = vld [vmem:[#allocation5 + $0x58] sm:$0xff]  ;;  %v2905_v7 = vld [vmem:[#allocation7 + $0x70] sm:$0xff]  ;;  %v2909_v8 = vld [vmem:[#allocation7 + $0x68] sm:$0xff]  ;;  %v3092_v40 = vshrl.u32 %v455_v39, 7  ;;  %s1538_s7 = sshll.u32 %s268_s28, 4  ;;  %p3683_p0 = scmp.ne.s32.totalorder %s3677_s23, 0  ;;  %s1539_s7 = int_to_ptr.vmem [resolvable:$true] %s1538_s7 }
  0x58   : > { %1920 = vmatpush3.msra.mxu0 %v2886_v1  ;;  %1955 = vmatpush3.msra.mxu1 %v2899_v5  ;;  %v2912_v9 = vld [vmem:[#allocation5 + $0x50] sm:$0xff]  ;;  %v2917_v10 = vld [vmem:[#allocation7 + $0x60] sm:$0xff]  ;;  %v2920_v11 = vld [vmem:[#allocation5 + $0x48] sm:$0xff]  ;;  %s2638_s26 = scalar_lea.vmem %s1539_s7, 128  ;;  %s2715_s22 = smov [#allocation8]  }
  0x59   : > { %1921 = vmatprep.subr.mxu0 %v2713_v0  ;;  %1956 = vmatprep.subr.mxu1 %v2713_v0  ;;  %v2925_v12 = vld [vmem:[#allocation7 + $0x58] sm:$0xff]  ;;  %v2928_v13 = vld [vmem:[#allocation5 + $0x40] sm:$0xff]  ;;  %v2933_v14 = vld [vmem:[#allocation7 + $0x50] sm:$0xff]  ;;  %v457_v43 = vsub.s32 0, %v3092_v40  ;;  %p2639_p11 = scmp.ne.s32.totalorder %s1539_s7, %s2638_s26  ;;  %s2642_s14 = sshll.u32 %s2715_s22, 4  ;;  %s2643_s14 = int_to_ptr.vmem [resolvable:$false] %s2642_s14 }
  0x5a   : > { %1922 = vmatpush3.msra.mxu0 %v2888_v2  ;;  %1957 = vmatpush3.msra.mxu1 %v2905_v7  ;;  %v2936_v15 = vld [vmem:[#allocation5 + $0x38] sm:$0xff]  ;;  %v2941_v16 = vld [vmem:[#allocation7 + $0x48] sm:$0xff]  ;;  %v2944_v17 = vld [vmem:[#allocation5 + $0x30] sm:$0xff]  ;;  %s2644_s8 = scalar_lea.vmem %s2643_s14, 256  ;;  %p2645_p6 = scmp.lt.s32.totalorder %s1539_s7, %s2643_s14 }
  0x5b   : > { %1923 = vmatprep.subr.mxu0 %v2713_v0  ;;  %1958 = vmatprep.subr.mxu1 %v2713_v0  ;;  %v2950_v18 = vld [vmem:[#allocation5 + $0x28] sm:$0xff]  ;;  %v2956_v19 = vld [vmem:[#allocation5 + $0x20] sm:$0xff]  ;;  %v2960_v20 = vld [vmem:[#allocation5 + $0x18] sm:$0xff]  ;;  %p2640_p1 = pnand %p2639_p11, %p3683_p0  ;;  %p2646_p12 = scmp.lt.s32.totalorder %s2644_s8, %s2638_s26 }
  0x5c   : > { %1924 = vmatpush3.msra.mxu0 %v2892_v3  ;;  %1959 = vmatpush3.msra.mxu1 %v2909_v8  ;;  %v2964_v21 = vld [vmem:[#allocation5 + $0x10] sm:$0xff]  ;;  %v2968_v22 = vld [vmem:[#allocation5 + $0x8] sm:$0xff]  ;;  %v2972_v23 = vld [vmem:[#allocation5] sm:$0xff] }
  0x5d   : > { %1925 = vmatprep.subr.mxu0 %v2713_v0  ;;  %1960 = vmatprep.subr.mxu1 %v2713_v0  ;;  %v2976_v24 = vld [vmem:[%s2870_s17] sm:$0xff]  ;;  %v3016_v25 = vld [vmem:[#allocation7 + $0x40] sm:$0xff]  ;;  %v3026_v28 = vld [vmem:[#allocation7 + $0x28] sm:$0xff]  ;;  %s1536_s17 = scalar_lea.hbm %s3667_s5, %s1644_s6  ;;  %p2641_p2 = pneg %p2640_p1 }
  0x5e   : > { %1926 = vmatpush3.msra.mxu0 %v2896_v4  ;;  %1961 = vmatpush3.msra.mxu1 %v2917_v10  ;;  %v3020_v26 = vld [vmem:[#allocation7 + $0x38] sm:$0xff]  ;;  %v3024_v27 = vld [vmem:[#allocation7 + $0x30] sm:$0xff]  ;;  %v3030_v29 = vld [vmem:[#allocation7 + $0x20] sm:$0xff]  ;;  %p2647_p7 = por %p2646_p12, %p2645_p6 }
  0x5f   : > { %1927 = vmatprep.subr.mxu0 %v2713_v0  ;;  %1962 = vmatprep.subr.mxu1 %v2713_v0  ;;  %v3034_v30 = vld [vmem:[#allocation7 + $0x18] sm:$0xff]  ;;  %v3038_v31 = vld [vmem:[#allocation7 + $0x10] sm:$0xff]  ;;  %v3042_v32 = vld [vmem:[#allocation7 + $0x8] sm:$0xff] }
  0x60   : > { %1928 = vmatpush3.msra.mxu0 %v2902_v6  ;;  %1963 = vmatpush3.msra.mxu1 %v2925_v12  ;;  %v3046_v33 = vld [vmem:[#allocation7] sm:$0xff]  ;;  %v3055_v34 = vld [vmem:[%s3664_s2] ss:$0 sm:$0xff]  ;;  %p2648_p9 = pnand %p2647_p7, %p2641_p2 }
  0x61   : > { %1929 = vmatprep.subr.mxu0 %v2713_v0  ;;  %1964 = vmatprep.subr.mxu1 %v2713_v0  ;;  %v303_v41 = vld [vmem:[%s3666_s4] sm:$0x1]  ;;  %v3401_v39 = vld [vmem:[#allocation7 + $0xa0] sm:$0xff] }
  0x62   : > { %1930 = vmatpush3.msra.mxu0 %v2912_v9  ;;  %1965 = vmatpush3.msra.mxu1 %v2933_v14  ;;  %v304_v42 = vmul.f32 0.25, %v303_v41  ;;  %v3407_v41 = vld [vmem:[%s3664_s2 + $0x1] ss:$0 sm:$0xff] }
  0x63   : > { %1931 = vmatprep.subr.mxu0 %v2713_v0  ;;  %1966 = vmatprep.subr.mxu1 %v2713_v0 }
  0x64   : > { %1932 = vmatpush3.msra.mxu0 %v2920_v11  ;;  %1967 = vmatpush3.msra.mxu1 %v2941_v16  ;;  %v3100_v46 = vrot.slane %v304_v42, %v457_v43  ;;  %v3410_v42 = vld [vmem:[#allocation7 + $0x98] sm:$0xff] }
  0x65   : > { %1933 = vmatprep.subr.mxu0 %v2713_v0  ;;  %1968 = vmatprep.subr.mxu1 %v2713_v0 }
  0x66   : > { %1934 = vmatpush3.msra.mxu0 %v2928_v13  ;;  %1969 = vmatpush3.msra.mxu1 %v3016_v25 }
  0x67   : > { %1935 = vmatprep.subr.mxu0 %v2713_v0  ;;  %1970 = vmatprep.subr.mxu1 %v2713_v0 }
  0x68   : > { %1936 = vmatpush3.msra.mxu0 %v2936_v15  ;;  %1971 = vmatpush3.msra.mxu1 %v3020_v26 }
  0x69   : > { %1937 = vmatprep.subr.mxu0 %v2713_v0  ;;  %1972 = vmatprep.subr.mxu1 %v2713_v0 }
  0x6a   : > { %1938 = vmatpush3.msra.mxu0 %v2944_v17  ;;  %1973 = vmatpush3.msra.mxu1 %v3024_v27 }
  0x6b   : > { %1939 = vmatprep.subr.mxu0 %v2713_v0  ;;  %1974 = vmatprep.subr.mxu1 %v2713_v0 }
  0x6c   : > { %1940 = vmatpush3.msra.mxu0 %v2950_v18  ;;  %1975 = vmatpush3.msra.mxu1 %v3026_v28 }
  0x6d   : > { %1941 = vmatprep.subr.mxu0 %v2713_v0  ;;  %1976 = vmatprep.subr.mxu1 %v2713_v0 }
  0x6e   : > { %1942 = vmatpush3.msra.mxu0 %v2956_v19  ;;  %1977 = vmatpush3.msra.mxu1 %v3030_v29 }
  0x6f   : > { %1943 = vmatprep.subr.mxu0 %v2713_v0  ;;  %1978 = vmatprep.subr.mxu1 %v2713_v0 }
  0x70   : > { %1944 = vmatpush3.msra.mxu0 %v2960_v20  ;;  %1979 = vmatpush3.msra.mxu1 %v3034_v30 }
  0x71   : > { %1945 = vmatprep.subr.mxu0 %v2713_v0  ;;  %1980 = vmatprep.subr.mxu1 %v2713_v0 }
  0x72   : > { %1946 = vmatpush3.msra.mxu0 %v2964_v21  ;;  %1981 = vmatpush3.msra.mxu1 %v3038_v31 }
  0x73   : > { %1947 = vmatprep.subr.mxu0 %v2713_v0  ;;  %1982 = vmatprep.subr.mxu1 %v2713_v0 }
  0x74   : > { %1948 = vmatpush3.msra.mxu0 %v2968_v22  ;;  %1983 = vmatpush3.msra.mxu1 %v3042_v32 }
  0x75   : > { %1949 = vmatprep.subr.mxu0 %v2713_v0  ;;  %1984 = vmatprep.subr.mxu1 %v2713_v0 }
  0x76   : > { %1950 = vmatpush3.msra.mxu0 %v2972_v23  ;;  %1985 = vmatpush3.msra.mxu1 %v3046_v33 }
  0x77   : > { %1952 = vmatmul.mubr.f32.vlgmr.msra.gmra.mxu0 %v2976_v24  ;;  %1989 = vmatprep.subr.mxu0 %v2713_v0 }
  0x78   : > { %1990 = vmatpush3.msra.mxu0 %v2886_v1  ;;  %2021 = vmatprep.mubr.msk.f32.mxu0 %vm2714_vm0, %v2713_v0 }
  0x79   : > { %1991 = vmatprep.subr.mxu0 %v2713_v0  ;;  %2024 = vmatprep.subr.mxu1 %v2713_v0 }
  0x7a   : > { %1992 = vmatpush3.msra.mxu0 %v2888_v2 }
  0x7b   : > { %1993 = vmatprep.subr.mxu0 %v2713_v0 }
  0x7c   : > { %1994 = vmatpush3.msra.mxu0 %v2892_v3 }
  0x7d   : > { %1995 = vmatprep.subr.mxu0 %v2713_v0 }
  0x7e   : > { %1996 = vmatpush3.msra.mxu0 %v2896_v4 }
  0x7f   : > { %1997 = vmatprep.subr.mxu0 %v2713_v0 }
  0x80   : > { %1998 = vmatpush3.msra.mxu0 %v2902_v6 }
  0x81   : > { %1999 = vmatprep.subr.mxu0 %v2713_v0 }
  0x82   : > { %2000 = vmatpush3.msra.mxu0 %v2912_v9 }
  0x83   : > { %2001 = vmatprep.subr.mxu0 %v2713_v0 }
  0x84   : > { %2002 = vmatpush3.msra.mxu0 %v2920_v11 }
  0x85   : > { %2003 = vmatprep.subr.mxu0 %v2713_v0 }
  0x86   : > { %2004 = vmatpush3.msra.mxu0 %v2928_v13 }
  0x87   : > { %2005 = vmatprep.subr.mxu0 %v2713_v0 }
  0x88   : > { %2006 = vmatpush3.msra.mxu0 %v2936_v15 }
  0x89   : > { %2007 = vmatprep.subr.mxu0 %v2713_v0 }
  0x8a   : > { %2008 = vmatpush3.msra.mxu0 %v2944_v17 }
  0x8b   : > { %2009 = vmatprep.subr.mxu0 %v2713_v0 }
  0x8c   : > { %2010 = vmatpush3.msra.mxu0 %v2950_v18 }
  0x8d   : > { %2011 = vmatprep.subr.mxu0 %v2713_v0 }
  0x8e   : > { %2012 = vmatpush3.msra.mxu0 %v2956_v19 }
  0x8f   : > { %2013 = vmatprep.subr.mxu0 %v2713_v0 }
  0x90   : > { %2014 = vmatpush3.msra.mxu0 %v2960_v20 }
  0x91   : > { %2015 = vmatprep.subr.mxu0 %v2713_v0 }
  0x92   : > { %2016 = vmatpush3.msra.mxu0 %v2964_v21 }
  0x93   : > { %2017 = vmatprep.subr.mxu0 %v2713_v0 }
  0x94   : > { %2018 = vmatpush3.msra.mxu0 %v2968_v22 }
  0x95   : > { %2019 = vmatprep.subr.mxu0 %v2713_v0 }
  0x96   : > { %2020 = vmatpush3.msra.mxu0 %v2972_v23 }
  0x97   : > { %2059 = vmatprep.subr.mxu0 %v2713_v0 }
 0x137   : > { %v377_v35 = vpop.f32.mrf.mxu0 }
 0x138   : > { %v378_v36 = vadd.f32 %v3055_v34, %v377_v35 }
 0x139   : > { %v1953_v37 = vpop.f32.mrf.mxu0 }
 0x13a   : > { %2550 = vtanh.f32 %v378_v36  ;;  %v3393_v36 = vld [vmem:[#allocation7 + $0xb0] sm:$0xff] }
 0x147   : > { %v2551_v38 = vpop.eup %2550 }
 0x148   : > { %1987 = vmatmul.mubr.f32.vlgmr.msra.gmra.mxu1 %v2551_v38  ;;  %v3397_v38 = vld [vmem:[#allocation7 + $0xa8] sm:$0xff] }
 0x149   : > { %2025 = vmatpush3.msra.mxu1 %v2899_v5  ;;  %2056 = vmatprep.mubr.msk.f32.mxu1 %vm2714_vm0, %v2713_v0 }
 0x14a   : > { %2026 = vmatprep.subr.mxu1 %v2713_v0 }
 0x14b   : > { %2027 = vmatpush3.msra.mxu1 %v2905_v7 }
 0x14c   : > { %2028 = vmatprep.subr.mxu1 %v2713_v0 }
 0x14d   : > { %2029 = vmatpush3.msra.mxu1 %v2909_v8 }
 0x14e   : > { %2030 = vmatprep.subr.mxu1 %v2713_v0 }
 0x14f   : > { %2031 = vmatpush3.msra.mxu1 %v2917_v10 }
 0x150   : > { %2032 = vmatprep.subr.mxu1 %v2713_v0 }
 0x151   : > { %2033 = vmatpush3.msra.mxu1 %v2925_v12 }
 0x152   : > { %2034 = vmatprep.subr.mxu1 %v2713_v0 }
 0x153   : > { %2035 = vmatpush3.msra.mxu1 %v2933_v14 }
 0x154   : > { %2036 = vmatprep.subr.mxu1 %v2713_v0 }
 0x155   : > { %2037 = vmatpush3.msra.mxu1 %v2941_v16 }
 0x156   : > { %2038 = vmatprep.subr.mxu1 %v2713_v0 }
 0x157   : > { %2039 = vmatpush3.msra.mxu1 %v3016_v25 }
 0x158   : > { %2040 = vmatprep.subr.mxu1 %v2713_v0 }
 0x159   : > { %2041 = vmatpush3.msra.mxu1 %v3020_v26 }
 0x15a   : > { %2042 = vmatprep.subr.mxu1 %v2713_v0 }
 0x15b   : > { %2043 = vmatpush3.msra.mxu1 %v3024_v27 }
 0x15c   : > { %2044 = vmatprep.subr.mxu1 %v2713_v0 }
 0x15d   : > { %2045 = vmatpush3.msra.mxu1 %v3026_v28 }
 0x15e   : > { %2046 = vmatprep.subr.mxu1 %v2713_v0 }
 0x15f   : > { %2047 = vmatpush3.msra.mxu1 %v3030_v29 }
 0x160   : > { %2048 = vmatprep.subr.mxu1 %v2713_v0 }
 0x161   : > { %2049 = vmatpush3.msra.mxu1 %v3034_v30 }
 0x162   : > { %2050 = vmatprep.subr.mxu1 %v2713_v0 }
 0x163   : > { %2051 = vmatpush3.msra.mxu1 %v3038_v31 }
 0x164   : > { %2052 = vmatprep.subr.mxu1 %v2713_v0 }
 0x165   : > { %2053 = vmatpush3.msra.mxu1 %v3042_v32 }
 0x166   : > { %2054 = vmatprep.subr.mxu1 %v2713_v0 }
 0x167   : > { %2055 = vmatpush3.msra.mxu1 %v3046_v33 }
 0x168   : > { %2094 = vmatprep.subr.mxu1 %v2713_v0 }
 0x208   : > { %v448_v44 = vpop.f32.mrf.mxu1 }
 0x209   : > { %v452_v45 = vmul.f32 0.25, %v448_v44 }
 0x20a   : > { %v1988_v47 = vpop.f32.mrf.mxu1 }
 0x20b   : > { %v453_v48 = vadd.f32 %v452_v45, %v2976_v24  ;;  %v3415_v45 = vld [vmem:[#allocation7 + $0x90] sm:$0xff]  ;;  %v3419_v47 = vld [vmem:[#allocation7 + $0x88] sm:$0xff] }
 0x20d   : > { %v3104_v49 = vadd.f32 %v3100_v46, %v453_v48 }
 0x20f   : > { %2022 = vmatmul.mubr.f32.vlgmr.msra.gmra.mxu0 %v3104_v49 }
 0x210   : > { %2060 = vmatpush3.msra.mxu0 %v2886_v1  ;;  %2091 = vmatprep.mubr.msk.f32.mxu0 %vm2714_vm0, %v2713_v0 }
 0x211   : > { %2061 = vmatprep.subr.mxu0 %v2713_v0 }
 0x212   : > { %2062 = vmatpush3.msra.mxu0 %v2888_v2 }
 0x213   : > { %2063 = vmatprep.subr.mxu0 %v2713_v0 }
 0x214   : > { %2064 = vmatpush3.msra.mxu0 %v2892_v3 }
 0x215   : > { %2065 = vmatprep.subr.mxu0 %v2713_v0 }
 0x216   : > { %2066 = vmatpush3.msra.mxu0 %v2896_v4 }
 0x217   : > { %2067 = vmatprep.subr.mxu0 %v2713_v0 }
 0x218   : > { %2068 = vmatpush3.msra.mxu0 %v2902_v6 }
 0x219   : > { %2069 = vmatprep.subr.mxu0 %v2713_v0 }
 0x21a   : > { %2070 = vmatpush3.msra.mxu0 %v2912_v9 }
 0x21b   : > { %2071 = vmatprep.subr.mxu0 %v2713_v0 }
 0x21c   : > { %2072 = vmatpush3.msra.mxu0 %v2920_v11 }
 0x21d   : > { %2073 = vmatprep.subr.mxu0 %v2713_v0 }
 0x21e   : > { %2074 = vmatpush3.msra.mxu0 %v2928_v13 }
 0x21f   : > { %2075 = vmatprep.subr.mxu0 %v2713_v0 }
 0x220   : > { %2076 = vmatpush3.msra.mxu0 %v2936_v15 }
 0x221   : > { %2077 = vmatprep.subr.mxu0 %v2713_v0 }
 0x222   : > { %2078 = vmatpush3.msra.mxu0 %v2944_v17 }
 0x223   : > { %2079 = vmatprep.subr.mxu0 %v2713_v0 }
 0x224   : > { %2080 = vmatpush3.msra.mxu0 %v2950_v18 }
 0x225   : > { %2081 = vmatprep.subr.mxu0 %v2713_v0 }
 0x226   : > { %2082 = vmatpush3.msra.mxu0 %v2956_v19 }
 0x227   : > { %2083 = vmatprep.subr.mxu0 %v2713_v0 }
 0x228   : > { %2084 = vmatpush3.msra.mxu0 %v2960_v20 }
 0x229   : > { %2085 = vmatprep.subr.mxu0 %v2713_v0 }
 0x22a   : > { %2086 = vmatpush3.msra.mxu0 %v2964_v21 }
 0x22b   : > { %2087 = vmatprep.subr.mxu0 %v2713_v0 }
 0x22c   : > { %2088 = vmatpush3.msra.mxu0 %v2968_v22 }
 0x22d   : > { %2089 = vmatprep.subr.mxu0 %v2713_v0 }
 0x22e   : > { %2090 = vmatpush3.msra.mxu0 %v2972_v23 }
 0x22f   : > { %2129 = vmatprep.subr.mxu0 %v2713_v0 }
 0x2cf   : > { %v527_v50 = vpop.f32.mrf.mxu0 }
 0x2d0   : > { %v528_v51 = vadd.f32 %v3055_v34, %v527_v50 }
 0x2d1   : > { %v2023_v52 = vpop.f32.mrf.mxu0 }
 0x2d2   : > { %2552 = vtanh.f32 %v528_v51  ;;  %v1641_v52 = vld [vmem:[%s3666_s4 + $0x1] sm:$0x1] }
 0x2df   : > { %v2553_v53 = vpop.eup %2552 }
 0x2e0   : > { %2057 = vmatmul.mubr.f32.vlgmr.msra.gmra.mxu1 %v2553_v53  ;;  %v932_v53 = vmul.f32 0.25, %v1641_v52 }
 0x2e1   : > { %2095 = vmatpush3.msra.mxu1 %v2899_v5  ;;  %2126 = vmatprep.mubr.msk.f32.mxu1 %vm2714_vm0, %v2713_v0 }
 0x2e2   : > { %2096 = vmatprep.subr.mxu1 %v2713_v0 }
 0x2e3   : > { %2097 = vmatpush3.msra.mxu1 %v2905_v7 }
 0x2e4   : > { %2098 = vmatprep.subr.mxu1 %v2713_v0 }
 0x2e5   : > { %2099 = vmatpush3.msra.mxu1 %v2909_v8 }
 0x2e6   : > { %2100 = vmatprep.subr.mxu1 %v2713_v0 }
 0x2e7   : > { %2101 = vmatpush3.msra.mxu1 %v2917_v10 }
 0x2e8   : > { %2102 = vmatprep.subr.mxu1 %v2713_v0 }
 0x2e9   : > { %2103 = vmatpush3.msra.mxu1 %v2925_v12 }
 0x2ea   : > { %2104 = vmatprep.subr.mxu1 %v2713_v0 }
 0x2eb   : > { %2105 = vmatpush3.msra.mxu1 %v2933_v14 }
 0x2ec   : > { %2106 = vmatprep.subr.mxu1 %v2713_v0 }
 0x2ed   : > { %2107 = vmatpush3.msra.mxu1 %v2941_v16 }
 0x2ee   : > { %2108 = vmatprep.subr.mxu1 %v2713_v0 }
 0x2ef   : > { %2109 = vmatpush3.msra.mxu1 %v3016_v25 }
 0x2f0   : > { %2110 = vmatprep.subr.mxu1 %v2713_v0 }
 0x2f1   : > { %2111 = vmatpush3.msra.mxu1 %v3020_v26 }
 0x2f2   : > { %2112 = vmatprep.subr.mxu1 %v2713_v0 }
 0x2f3   : > { %2113 = vmatpush3.msra.mxu1 %v3024_v27 }
 0x2f4   : > { %2114 = vmatprep.subr.mxu1 %v2713_v0 }
 0x2f5   : > { %2115 = vmatpush3.msra.mxu1 %v3026_v28 }
 0x2f6   : > { %2116 = vmatprep.subr.mxu1 %v2713_v0 }
 0x2f7   : > { %2117 = vmatpush3.msra.mxu1 %v3030_v29 }
 0x2f8   : > { %2118 = vmatprep.subr.mxu1 %v2713_v0 }
 0x2f9   : > { %2119 = vmatpush3.msra.mxu1 %v3034_v30 }
 0x2fa   : > { %2120 = vmatprep.subr.mxu1 %v2713_v0 }
 0x2fb   : > { %2121 = vmatpush3.msra.mxu1 %v3038_v31 }
 0x2fc   : > { %2122 = vmatprep.subr.mxu1 %v2713_v0 }
 0x2fd   : > { %2123 = vmatpush3.msra.mxu1 %v3042_v32 }
 0x2fe   : > { %2124 = vmatprep.subr.mxu1 %v2713_v0 }
 0x2ff   : > { %2125 = vmatpush3.msra.mxu1 %v3046_v33 }
 0x300   : > { %2164 = vmatprep.subr.mxu1 %v2713_v0 }
 0x3a0   : > { %v598_v54 = vpop.f32.mrf.mxu1 }
 0x3a1   : > { %v602_v55 = vmul.f32 0.25, %v598_v54 }
 0x3a2   : > { %v2058_v56 = vpop.f32.mrf.mxu1 }
 0x3a3   : > { %v603_v57 = vadd.f32 %v602_v55, %v3104_v49  ;;  %v3423_v49 = vld [vmem:[#allocation7 + $0x80] sm:$0xff]  ;;  %v3470_v56 = vrot.slane %v932_v53, %v457_v43 }
 0x3a5   : > { %v3178_v58 = vadd.f32 %v603_v57, %v3100_v46 }
 0x3a7   : > { %2092 = vmatmul.mubr.f32.vlgmr.msra.gmra.mxu0 %v3178_v58 }
 0x3a8   : > { %2130 = vmatpush3.msra.mxu0 %v2886_v1  ;;  %2161 = vmatprep.mubr.msk.f32.mxu0 %vm2714_vm0, %v2713_v0 }
 0x3a9   : > { %2131 = vmatprep.subr.mxu0 %v2713_v0 }
 0x3aa   : > { %2132 = vmatpush3.msra.mxu0 %v2888_v2 }
 0x3ab   : > { %2133 = vmatprep.subr.mxu0 %v2713_v0 }
 0x3ac   : > { %2134 = vmatpush3.msra.mxu0 %v2892_v3 }
 0x3ad   : > { %2135 = vmatprep.subr.mxu0 %v2713_v0 }
 0x3ae   : > { %2136 = vmatpush3.msra.mxu0 %v2896_v4 }
 0x3af   : > { %2137 = vmatprep.subr.mxu0 %v2713_v0 }
 0x3b0   : > { %2138 = vmatpush3.msra.mxu0 %v2902_v6  ;;  %v3257_v6 = vld [vmem:[#allocation5 + $0xf0] sm:$0xff] }
 0x3b1   : > { %2139 = vmatprep.subr.mxu0 %v2713_v0 }
 0x3b2   : > { %2140 = vmatpush3.msra.mxu0 %v2912_v9  ;;  %v3271_v9 = vld [vmem:[#allocation5 + $0xd8] sm:$0xff] }
 0x3b3   : > { %2141 = vmatprep.subr.mxu0 %v2713_v0 }
 0x3b4   : > { %2142 = vmatpush3.msra.mxu0 %v2920_v11  ;;  %v3279_v11 = vld [vmem:[#allocation5 + $0xc8] sm:$0xff] }
 0x3b5   : > { %2143 = vmatprep.subr.mxu0 %v2713_v0 }
 0x3b6   : > { %2144 = vmatpush3.msra.mxu0 %v2928_v13  ;;  %v3287_v13 = vld [vmem:[#allocation5 + $0xb8] sm:$0xff] }
 0x3b7   : > { %2145 = vmatprep.subr.mxu0 %v2713_v0 }
 0x3b8   : > { %2146 = vmatpush3.msra.mxu0 %v2936_v15  ;;  %v3295_v15 = vld [vmem:[#allocation5 + $0xa8] sm:$0xff] }
 0x3b9   : > { %2147 = vmatprep.subr.mxu0 %v2713_v0 }
 0x3ba   : > { %2148 = vmatpush3.msra.mxu0 %v2944_v17  ;;  %v3303_v17 = vld [vmem:[#allocation5 + $0x98] sm:$0xff] }
 0x3bb   : > { %2149 = vmatprep.subr.mxu0 %v2713_v0 }
 0x3bc   : > { %2150 = vmatpush3.msra.mxu0 %v2950_v18  ;;  %v3307_v18 = vld [vmem:[#allocation5 + $0x90] sm:$0xff] }
 0x3bd   : > { %2151 = vmatprep.subr.mxu0 %v2713_v0 }
 0x3be   : > { %2152 = vmatpush3.msra.mxu0 %v2956_v19  ;;  %v3311_v19 = vld [vmem:[#allocation5 + $0x88] sm:$0xff] }
 0x3bf   : > { %2153 = vmatprep.subr.mxu0 %v2713_v0 }
 0x3c0   : > { %2154 = vmatpush3.msra.mxu0 %v2960_v20  ;;  %v3315_v20 = vld [vmem:[#allocation5 + $0x80] sm:$0xff] }
 0x3c1   : > { %2155 = vmatprep.subr.mxu0 %v2713_v0 }
 0x3c2   : > { %2156 = vmatpush3.msra.mxu0 %v2964_v21 }
 0x3c3   : > { %2157 = vmatprep.subr.mxu0 %v2713_v0 }
 0x3c4   : > { %2158 = vmatpush3.msra.mxu0 %v2968_v22 }
 0x3c5   : > { %2159 = vmatprep.subr.mxu0 %v2713_v0 }
 0x3c6   : > { %2160 = vmatpush3.msra.mxu0 %v2972_v23 }
 0x3c7   : > { %2199 = vmatprep.subr.mxu0 %v2713_v0 }
 0x467   : > { %v671_v59 = vpop.f32.mrf.mxu0 }
 0x468   : > { %v672_v60 = vadd.f32 %v3055_v34, %v671_v59 }
 0x469   : > { %v2093_v61 = vpop.f32.mrf.mxu0 }
 0x46a   : > { %2554 = vtanh.f32 %v672_v60 }
 0x477   : > { %v2555_v62 = vpop.eup %2554 }
 0x478   : > { %2127 = vmatmul.mubr.f32.vlgmr.msra.gmra.mxu1 %v2555_v62 }
 0x479   : > { %2165 = vmatpush3.msra.mxu1 %v2899_v5  ;;  %2196 = vmatprep.mubr.msk.f32.mxu1 %vm2714_vm0, %v2713_v0  ;;  %v3254_v5 = vld [vmem:[#allocation5 + $0xf8] sm:$0xff] }
 0x47a   : > { %2166 = vmatprep.subr.mxu1 %v2713_v0 }
 0x47b   : > { %2167 = vmatpush3.msra.mxu1 %v2905_v7  ;;  %v3263_v7 = vld [vmem:[#allocation5 + $0xe8] sm:$0xff] }
 0x47c   : > { %2168 = vmatprep.subr.mxu1 %v2713_v0 }
 0x47d   : > { %2169 = vmatpush3.msra.mxu1 %v2909_v8  ;;  %v3267_v8 = vld [vmem:[#allocation5 + $0xe0] sm:$0xff] }
 0x47e   : > { %2170 = vmatprep.subr.mxu1 %v2713_v0 }
 0x47f   : > { %2171 = vmatpush3.msra.mxu1 %v2917_v10  ;;  %v3275_v10 = vld [vmem:[#allocation5 + $0xd0] sm:$0xff] }
 0x480   : > { %2172 = vmatprep.subr.mxu1 %v2713_v0 }
 0x481   : > { %2173 = vmatpush3.msra.mxu1 %v2925_v12  ;;  %v3283_v12 = vld [vmem:[#allocation5 + $0xc0] sm:$0xff] }
 0x482   : > { %2174 = vmatprep.subr.mxu1 %v2713_v0 }
 0x483   : > { %2175 = vmatpush3.msra.mxu1 %v2933_v14  ;;  %v3291_v14 = vld [vmem:[#allocation5 + $0xb0] sm:$0xff] }
 0x484   : > { %2176 = vmatprep.subr.mxu1 %v2713_v0 }
 0x485   : > { %2177 = vmatpush3.msra.mxu1 %v2941_v16  ;;  %v3299_v16 = vld [vmem:[#allocation5 + $0xa0] sm:$0xff] }
 0x486   : > { %2178 = vmatprep.subr.mxu1 %v2713_v0 }
 0x487   : > { %2179 = vmatpush3.msra.mxu1 %v3016_v25  ;;  %v3357_v25 = vld [vmem:[#allocation7 + $0xf8] sm:$0xff] }
 0x488   : > { %2180 = vmatprep.subr.mxu1 %v2713_v0 }
 0x489   : > { %2181 = vmatpush3.msra.mxu1 %v3020_v26 }
 0x48a   : > { %2182 = vmatprep.subr.mxu1 %v2713_v0 }
 0x48b   : > { %2183 = vmatpush3.msra.mxu1 %v3024_v27  ;;  %v3359_v27 = vld [vmem:[#allocation7 + $0xf0] sm:$0xff] }
 0x48c   : > { %2184 = vmatprep.subr.mxu1 %v2713_v0 }
 0x48d   : > { %2185 = vmatpush3.msra.mxu1 %v3026_v28  ;;  %v3365_v28 = vld [vmem:[#allocation7 + $0xe8] sm:$0xff] }
 0x48e   : > { %2186 = vmatprep.subr.mxu1 %v2713_v0 }
 0x48f   : > { %2187 = vmatpush3.msra.mxu1 %v3030_v29  ;;  %v3369_v29 = vld [vmem:[#allocation7 + $0xe0] sm:$0xff] }
 0x490   : > { %2188 = vmatprep.subr.mxu1 %v2713_v0 }
 0x491   : > { %2189 = vmatpush3.msra.mxu1 %v3034_v30  ;;  %v3373_v30 = vld [vmem:[#allocation7 + $0xd8] sm:$0xff] }
 0x492   : > { %2190 = vmatprep.subr.mxu1 %v2713_v0 }
 0x493   : > { %2191 = vmatpush3.msra.mxu1 %v3038_v31  ;;  %v3377_v31 = vld [vmem:[#allocation7 + $0xd0] sm:$0xff] }
 0x494   : > { %2192 = vmatprep.subr.mxu1 %v2713_v0 }
 0x495   : > { %2193 = vmatpush3.msra.mxu1 %v3042_v32  ;;  %v3381_v32 = vld [vmem:[#allocation7 + $0xc8] sm:$0xff] }
 0x496   : > { %2194 = vmatprep.subr.mxu1 %v2713_v0 }
 0x497   : > { %2195 = vmatpush3.msra.mxu1 %v3046_v33  ;;  %v3385_v33 = vld [vmem:[#allocation7 + $0xc0] sm:$0xff] }
 0x498   : > { %2234 = vmatprep.subr.mxu1 %v2713_v0 }
 0x538   : > { %v742_v63 = vpop.f32.mrf.mxu1 }
 0x539   : > { %v746_v1 = vmul.f32 0.25, %v742_v63 }
 0x53a   : > { %v2128_v2 = vpop.f32.mrf.mxu1 }
 0x53b   : > { %v747_v3 = vadd.f32 %v746_v1, %v3178_v58 }
 0x53d   : > { %v3252_v4 = vadd.f32 %v747_v3, %v3100_v46 }
 0x53f   : > { %2162 = vmatmul.mubr.f32.vlgmr.msra.gmra.mxu0 %v3252_v4 }
 0x540   : > { %2200 = vmatpush3.msra.mxu0 %v3254_v5  ;;  %2231 = vmatprep.mubr.msk.f32.mxu0 %vm2714_vm0, %v2713_v0 }
 0x541   : > { %2201 = vmatprep.subr.mxu0 %v2713_v0 }
 0x542   : > { %2202 = vmatpush3.msra.mxu0 %v3257_v6 }
 0x543   : > { %2203 = vmatprep.subr.mxu0 %v2713_v0 }
 0x544   : > { %2204 = vmatpush3.msra.mxu0 %v3263_v7 }
 0x545   : > { %2205 = vmatprep.subr.mxu0 %v2713_v0 }
 0x546   : > { %2206 = vmatpush3.msra.mxu0 %v3267_v8 }
 0x547   : > { %2207 = vmatprep.subr.mxu0 %v2713_v0 }
 0x548   : > { %2208 = vmatpush3.msra.mxu0 %v3271_v9 }
 0x549   : > { %2209 = vmatprep.subr.mxu0 %v2713_v0 }
 0x54a   : > { %2210 = vmatpush3.msra.mxu0 %v3275_v10 }
 0x54b   : > { %2211 = vmatprep.subr.mxu0 %v2713_v0 }
 0x54c   : > { %2212 = vmatpush3.msra.mxu0 %v3279_v11 }
 0x54d   : > { %2213 = vmatprep.subr.mxu0 %v2713_v0 }
 0x54e   : > { %2214 = vmatpush3.msra.mxu0 %v3283_v12 }
 0x54f   : > { %2215 = vmatprep.subr.mxu0 %v2713_v0 }
 0x550   : > { %2216 = vmatpush3.msra.mxu0 %v3287_v13 }
 0x551   : > { %2217 = vmatprep.subr.mxu0 %v2713_v0 }
 0x552   : > { %2218 = vmatpush3.msra.mxu0 %v3291_v14 }
 0x553   : > { %2219 = vmatprep.subr.mxu0 %v2713_v0 }
 0x554   : > { %2220 = vmatpush3.msra.mxu0 %v3295_v15 }
 0x555   : > { %2221 = vmatprep.subr.mxu0 %v2713_v0 }
 0x556   : > { %2222 = vmatpush3.msra.mxu0 %v3299_v16 }
 0x557   : > { %2223 = vmatprep.subr.mxu0 %v2713_v0 }
 0x558   : > { %2224 = vmatpush3.msra.mxu0 %v3303_v17 }
 0x559   : > { %2225 = vmatprep.subr.mxu0 %v2713_v0 }
 0x55a   : > { %2226 = vmatpush3.msra.mxu0 %v3307_v18 }
 0x55b   : > { %2227 = vmatprep.subr.mxu0 %v2713_v0 }
 0x55c   : > { %2228 = vmatpush3.msra.mxu0 %v3311_v19 }
 0x55d   : > { %2229 = vmatprep.subr.mxu0 %v2713_v0 }
 0x55e   : > { %2230 = vmatpush3.msra.mxu0 %v3315_v20 }
 0x55f   : > { %2232 = vmatmul.mubr.f32.vlgmr.msra.gmra.mxu0 %v2976_v24  ;;  %2269 = vmatprep.subr.mxu0 %v2713_v0 }
 0x560   : > { %2270 = vmatpush3.msra.mxu0 %v3254_v5  ;;  %2301 = vmatprep.mubr.msk.f32.mxu0 %vm2714_vm0, %v2713_v0 }
 0x561   : > { %2271 = vmatprep.subr.mxu0 %v2713_v0 }
 0x562   : > { %2272 = vmatpush3.msra.mxu0 %v3257_v6 }
 0x563   : > { %2273 = vmatprep.subr.mxu0 %v2713_v0 }
 0x564   : > { %2274 = vmatpush3.msra.mxu0 %v3263_v7 }
 0x565   : > { %2275 = vmatprep.subr.mxu0 %v2713_v0 }
 0x566   : > { %2276 = vmatpush3.msra.mxu0 %v3267_v8 }
 0x567   : > { %2277 = vmatprep.subr.mxu0 %v2713_v0 }
 0x568   : > { %2278 = vmatpush3.msra.mxu0 %v3271_v9 }
 0x569   : > { %2279 = vmatprep.subr.mxu0 %v2713_v0 }
 0x56a   : > { %2280 = vmatpush3.msra.mxu0 %v3275_v10 }
 0x56b   : > { %2281 = vmatprep.subr.mxu0 %v2713_v0 }
 0x56c   : > { %2282 = vmatpush3.msra.mxu0 %v3279_v11 }
 0x56d   : > { %2283 = vmatprep.subr.mxu0 %v2713_v0 }
 0x56e   : > { %2284 = vmatpush3.msra.mxu0 %v3283_v12 }
 0x56f   : > { %2285 = vmatprep.subr.mxu0 %v2713_v0 }
 0x570   : > { %2286 = vmatpush3.msra.mxu0 %v3287_v13 }
 0x571   : > { %2287 = vmatprep.subr.mxu0 %v2713_v0 }
 0x572   : > { %2288 = vmatpush3.msra.mxu0 %v3291_v14 }
 0x573   : > { %2289 = vmatprep.subr.mxu0 %v2713_v0 }
 0x574   : > { %2290 = vmatpush3.msra.mxu0 %v3295_v15 }
 0x575   : > { %2291 = vmatprep.subr.mxu0 %v2713_v0 }
 0x576   : > { %2292 = vmatpush3.msra.mxu0 %v3299_v16 }
 0x577   : > { %2293 = vmatprep.subr.mxu0 %v2713_v0 }
 0x578   : > { %2294 = vmatpush3.msra.mxu0 %v3303_v17 }
 0x579   : > { %2295 = vmatprep.subr.mxu0 %v2713_v0 }
 0x57a   : > { %2296 = vmatpush3.msra.mxu0 %v3307_v18 }
 0x57b   : > { %2297 = vmatprep.subr.mxu0 %v2713_v0 }
 0x57c   : > { %2298 = vmatpush3.msra.mxu0 %v3311_v19 }
 0x57d   : > { %2299 = vmatprep.subr.mxu0 %v2713_v0 }
 0x57e   : > { %2300 = vmatpush3.msra.mxu0 %v3315_v20 }
 0x57f   : > { %2339 = vmatprep.subr.mxu0 %v2713_v0 }
 0x5ff   : > { %v815_v21 = vpop.f32.mrf.mxu0 }
 0x600   : > { %v816_v22 = vadd.f32 %v3055_v34, %v815_v21  ;;  %v3389_v34 = vld [vmem:[#allocation7 + $0xb8] sm:$0xff] }
 0x601   : > { %v2163_v23 = vpop.f32.mrf.mxu0 }
 0x602   : > { %2556 = vtanh.f32 %v816_v22 }
 0x60f   : > { %v2557_v26 = vpop.eup %2556 }
 0x610   : > { %2197 = vmatmul.mubr.f32.vlgmr.msra.gmra.mxu1 %v2557_v26 }
 0x611   : > { %2235 = vmatpush3.msra.mxu1 %v3357_v25  ;;  %2266 = vmatprep.mubr.msk.f32.mxu1 %vm2714_vm0, %v2713_v0 }
 0x612   : > { %2236 = vmatprep.subr.mxu1 %v2713_v0 }
 0x613   : > { %2237 = vmatpush3.msra.mxu1 %v3359_v27 }
 0x614   : > { %2238 = vmatprep.subr.mxu1 %v2713_v0 }
 0x615   : > { %2239 = vmatpush3.msra.mxu1 %v3365_v28 }
 0x616   : > { %2240 = vmatprep.subr.mxu1 %v2713_v0 }
 0x617   : > { %2241 = vmatpush3.msra.mxu1 %v3369_v29 }
 0x618   : > { %2242 = vmatprep.subr.mxu1 %v2713_v0 }
 0x619   : > { %2243 = vmatpush3.msra.mxu1 %v3373_v30 }
 0x61a   : > { %2244 = vmatprep.subr.mxu1 %v2713_v0 }
 0x61b   : > { %2245 = vmatpush3.msra.mxu1 %v3377_v31 }
 0x61c   : > { %2246 = vmatprep.subr.mxu1 %v2713_v0 }
 0x61d   : > { %2247 = vmatpush3.msra.mxu1 %v3381_v32 }
 0x61e   : > { %2248 = vmatprep.subr.mxu1 %v2713_v0 }
 0x61f   : > { %2249 = vmatpush3.msra.mxu1 %v3385_v33  ;;  %v1005_v35 = vpop.f32.mrf.mxu0 }
 0x620   : > { %2250 = vmatprep.subr.mxu1 %v2713_v0  ;;  %v1006_v44 = vadd.f32 %v3407_v41, %v1005_v35 }
 0x621   : > { %2251 = vmatpush3.msra.mxu1 %v3389_v34  ;;  %v2233_v37 = vpop.f32.mrf.mxu0 }
 0x622   : > { %2252 = vmatprep.subr.mxu1 %v2713_v0  ;;  %v1009_v48 = vmax.f32 %v1006_v44, 0.0 }
 0x623   : > { %2253 = vmatpush3.msra.mxu1 %v3393_v36 }
 0x624   : > { %2254 = vmatprep.subr.mxu1 %v2713_v0 }
 0x625   : > { %2255 = vmatpush3.msra.mxu1 %v3397_v38 }
 0x626   : > { %2256 = vmatprep.subr.mxu1 %v2713_v0 }
 0x627   : > { %2257 = vmatpush3.msra.mxu1 %v3401_v39 }
 0x628   : > { %2258 = vmatprep.subr.mxu1 %v2713_v0 }
 0x629   : > { %2259 = vmatpush3.msra.mxu1 %v3410_v42 }
 0x62a   : > { %2260 = vmatprep.subr.mxu1 %v2713_v0 }
 0x62b   : > { %2261 = vmatpush3.msra.mxu1 %v3415_v45 }
 0x62c   : > { %2262 = vmatprep.subr.mxu1 %v2713_v0 }
 0x62d   : > { %2263 = vmatpush3.msra.mxu1 %v3419_v47 }
 0x62e   : > { %2264 = vmatprep.subr.mxu1 %v2713_v0 }
 0x62f   : > { %2265 = vmatpush3.msra.mxu1 %v3423_v49 }
 0x630   : > { %2267 = vmatmul.mubr.f32.vlgmr.msra.gmra.mxu1 %v1009_v48  ;;  %2304 = vmatprep.subr.mxu1 %v2713_v0 }
 0x631   : > { %2305 = vmatpush3.msra.mxu1 %v3357_v25  ;;  %2336 = vmatprep.mubr.msk.f32.mxu1 %vm2714_vm0, %v2713_v0 }
 0x632   : > { %2306 = vmatprep.subr.mxu1 %v2713_v0 }
 0x633   : > { %2307 = vmatpush3.msra.mxu1 %v3359_v27 }
 0x634   : > { %2308 = vmatprep.subr.mxu1 %v2713_v0 }
 0x635   : > { %2309 = vmatpush3.msra.mxu1 %v3365_v28 }
 0x636   : > { %2310 = vmatprep.subr.mxu1 %v2713_v0 }
 0x637   : > { %2311 = vmatpush3.msra.mxu1 %v3369_v29 }
 0x638   : > { %2312 = vmatprep.subr.mxu1 %v2713_v0 }
 0x639   : > { %2313 = vmatpush3.msra.mxu1 %v3373_v30 }
 0x63a   : > { %2314 = vmatprep.subr.mxu1 %v2713_v0 }
 0x63b   : > { %2315 = vmatpush3.msra.mxu1 %v3377_v31 }
 0x63c   : > { %2316 = vmatprep.subr.mxu1 %v2713_v0 }
 0x63d   : > { %2317 = vmatpush3.msra.mxu1 %v3381_v32 }
 0x63e   : > { %2318 = vmatprep.subr.mxu1 %v2713_v0 }
 0x63f   : > { %2319 = vmatpush3.msra.mxu1 %v3385_v33 }
 0x640   : > { %2320 = vmatprep.subr.mxu1 %v2713_v0 }
 0x641   : > { %2321 = vmatpush3.msra.mxu1 %v3389_v34 }
 0x642   : > { %2322 = vmatprep.subr.mxu1 %v2713_v0 }
 0x643   : > { %2323 = vmatpush3.msra.mxu1 %v3393_v36 }
 0x644   : > { %2324 = vmatprep.subr.mxu1 %v2713_v0 }
 0x645   : > { %2325 = vmatpush3.msra.mxu1 %v3397_v38 }
 0x646   : > { %2326 = vmatprep.subr.mxu1 %v2713_v0 }
 0x647   : > { %2327 = vmatpush3.msra.mxu1 %v3401_v39 }
 0x648   : > { %2328 = vmatprep.subr.mxu1 %v2713_v0 }
 0x649   : > { %2329 = vmatpush3.msra.mxu1 %v3410_v42 }
 0x64a   : > { %2330 = vmatprep.subr.mxu1 %v2713_v0 }
 0x64b   : > { %2331 = vmatpush3.msra.mxu1 %v3415_v45 }
 0x64c   : > { %2332 = vmatprep.subr.mxu1 %v2713_v0 }
 0x64d   : > { %2333 = vmatpush3.msra.mxu1 %v3419_v47 }
 0x64e   : > { %2334 = vmatprep.subr.mxu1 %v2713_v0 }
 0x64f   : > { %2335 = vmatpush3.msra.mxu1 %v3423_v49 }
 0x650   : > { %2374 = vmatprep.subr.mxu1 %v2713_v0 }
 0x6d0   : > { %v3463_v50 = vpop.f32.mrf.mxu1 }
 0x6d2   : > { %v2198_v51 = vpop.f32.mrf.mxu1 }
 0x6f0   : > { %v1076_v54 = vpop.f32.mrf.mxu1 }
 0x6f1   : > { %v1080_v55 = vmul.f32 0.25, %v1076_v54 }
 0x6f2   : > { %v2268_v57 = vpop.f32.mrf.mxu1 }
 0x6f3   : > { %v1081_v58 = vadd.f32 %v1080_v55, %v2976_v24 }
 0x6f5   : > { %v3474_v59 = vadd.f32 %v3470_v56, %v1081_v58 }
 0x6f7   : > { %2302 = vmatmul.mubr.f32.vlgmr.msra.gmra.mxu0 %v3474_v59 }
 0x6f8   : > { %2340 = vmatpush3.msra.mxu0 %v3254_v5  ;;  %2371 = vmatprep.mubr.msk.f32.mxu0 %vm2714_vm0, %v2713_v0 }
 0x6f9   : > { %2341 = vmatprep.subr.mxu0 %v2713_v0 }
 0x6fa   : > { %2342 = vmatpush3.msra.mxu0 %v3257_v6 }
 0x6fb   : > { %2343 = vmatprep.subr.mxu0 %v2713_v0 }
 0x6fc   : > { %2344 = vmatpush3.msra.mxu0 %v3263_v7 }
 0x6fd   : > { %2345 = vmatprep.subr.mxu0 %v2713_v0 }
 0x6fe   : > { %2346 = vmatpush3.msra.mxu0 %v3267_v8 }
 0x6ff   : > { %2347 = vmatprep.subr.mxu0 %v2713_v0 }
 0x700   : > { %2348 = vmatpush3.msra.mxu0 %v3271_v9 }
 0x701   : > { %2349 = vmatprep.subr.mxu0 %v2713_v0 }
 0x702   : > { %2350 = vmatpush3.msra.mxu0 %v3275_v10 }
 0x703   : > { %2351 = vmatprep.subr.mxu0 %v2713_v0 }
 0x704   : > { %2352 = vmatpush3.msra.mxu0 %v3279_v11 }
 0x705   : > { %2353 = vmatprep.subr.mxu0 %v2713_v0 }
 0x706   : > { %2354 = vmatpush3.msra.mxu0 %v3283_v12 }
 0x707   : > { %2355 = vmatprep.subr.mxu0 %v2713_v0 }
 0x708   : > { %2356 = vmatpush3.msra.mxu0 %v3287_v13 }
 0x709   : > { %2357 = vmatprep.subr.mxu0 %v2713_v0 }
 0x70a   : > { %2358 = vmatpush3.msra.mxu0 %v3291_v14 }
 0x70b   : > { %2359 = vmatprep.subr.mxu0 %v2713_v0 }
 0x70c   : > { %2360 = vmatpush3.msra.mxu0 %v3295_v15 }
 0x70d   : > { %2361 = vmatprep.subr.mxu0 %v2713_v0 }
 0x70e   : > { %2362 = vmatpush3.msra.mxu0 %v3299_v16 }
 0x70f   : > { %2363 = vmatprep.subr.mxu0 %v2713_v0 }
 0x710   : > { %2364 = vmatpush3.msra.mxu0 %v3303_v17 }
 0x711   : > { %2365 = vmatprep.subr.mxu0 %v2713_v0 }
 0x712   : > { %2366 = vmatpush3.msra.mxu0 %v3307_v18 }
 0x713   : > { %2367 = vmatprep.subr.mxu0 %v2713_v0 }
 0x714   : > { %2368 = vmatpush3.msra.mxu0 %v3311_v19 }
 0x715   : > { %2369 = vmatprep.subr.mxu0 %v2713_v0 }
 0x716   : > { %2370 = vmatpush3.msra.mxu0 %v3315_v20 }
 0x717   : > { %2409 = vmatprep.subr.mxu0 %v2713_v0 }
 0x7b7   : > { %v1155_v24 = vpop.f32.mrf.mxu0 }
 0x7b8   : > { %v1156_v40 = vadd.f32 %v3407_v41, %v1155_v24 }
 0x7b9   : > { %v2303_v43 = vpop.f32.mrf.mxu0 }
 0x7ba   : > { %v1159_v60 = vmax.f32 %v1156_v40, 0.0 }
 0x7bc   : > { %2337 = vmatmul.mubr.f32.vlgmr.msra.gmra.mxu1 %v1159_v60 }
 0x7bd   : > { %2375 = vmatpush3.msra.mxu1 %v3357_v25  ;;  %2406 = vmatprep.mubr.msk.f32.mxu1 %vm2714_vm0, %v2713_v0 }
 0x7be   : > { %2376 = vmatprep.subr.mxu1 %v2713_v0 }
 0x7bf   : > { %2377 = vmatpush3.msra.mxu1 %v3359_v27 }
 0x7c0   : > { %2378 = vmatprep.subr.mxu1 %v2713_v0 }
 0x7c1   : > { %2379 = vmatpush3.msra.mxu1 %v3365_v28 }
 0x7c2   : > { %2380 = vmatprep.subr.mxu1 %v2713_v0 }
 0x7c3   : > { %2381 = vmatpush3.msra.mxu1 %v3369_v29 }
 0x7c4   : > { %2382 = vmatprep.subr.mxu1 %v2713_v0 }
 0x7c5   : > { %2383 = vmatpush3.msra.mxu1 %v3373_v30 }
 0x7c6   : > { %2384 = vmatprep.subr.mxu1 %v2713_v0 }
 0x7c7   : > { %2385 = vmatpush3.msra.mxu1 %v3377_v31 }
 0x7c8   : > { %2386 = vmatprep.subr.mxu1 %v2713_v0 }
 0x7c9   : > { %2387 = vmatpush3.msra.mxu1 %v3381_v32 }
 0x7ca   : > { %2388 = vmatprep.subr.mxu1 %v2713_v0 }
 0x7cb   : > { %2389 = vmatpush3.msra.mxu1 %v3385_v33 }
 0x7cc   : > { %2390 = vmatprep.subr.mxu1 %v2713_v0 }
 0x7cd   : > { %2391 = vmatpush3.msra.mxu1 %v3389_v34 }
 0x7ce   : > { %2392 = vmatprep.subr.mxu1 %v2713_v0 }
 0x7cf   : > { %2393 = vmatpush3.msra.mxu1 %v3393_v36 }
 0x7d0   : > { %2394 = vmatprep.subr.mxu1 %v2713_v0 }
 0x7d1   : > { %2395 = vmatpush3.msra.mxu1 %v3397_v38 }
 0x7d2   : > { %2396 = vmatprep.subr.mxu1 %v2713_v0 }
 0x7d3   : > { %2397 = vmatpush3.msra.mxu1 %v3401_v39 }
 0x7d4   : > { %2398 = vmatprep.subr.mxu1 %v2713_v0 }
 0x7d5   : > { %2399 = vmatpush3.msra.mxu1 %v3410_v42 }
 0x7d6   : > { %2400 = vmatprep.subr.mxu1 %v2713_v0 }
 0x7d7   : > { %2401 = vmatpush3.msra.mxu1 %v3415_v45 }
 0x7d8   : > { %2402 = vmatprep.subr.mxu1 %v2713_v0 }
 0x7d9   : > { %2403 = vmatpush3.msra.mxu1 %v3419_v47 }
 0x7da   : > { %2404 = vmatprep.subr.mxu1 %v2713_v0 }
 0x7db   : > { %2405 = vmatpush3.msra.mxu1 %v3423_v49 }
 0x7dc   : > { %2444 = vmatprep.subr.mxu1 %v2713_v0 }
 0x87c   : > { %v1226_v61 = vpop.f32.mrf.mxu1 }
 0x87d   : > { %v1230_v62 = vmul.f32 0.25, %v1226_v61 }
 0x87e   : > { %v2338_v63 = vpop.f32.mrf.mxu1 }
 0x87f   : > { %v1231_v1 = vadd.f32 %v1230_v62, %v3474_v59 }
 0x881   : > { %v3548_v2 = vadd.f32 %v1231_v1, %v3470_v56 }
 0x883   : > { %2372 = vmatmul.mubr.f32.vlgmr.msra.gmra.mxu0 %v3548_v2 }
 0x884   : > { %2410 = vmatpush3.msra.mxu0 %v3254_v5  ;;  %2441 = vmatprep.mubr.msk.f32.mxu0 %vm2714_vm0, %v2713_v0 }
 0x885   : > { %2411 = vmatprep.subr.mxu0 %v2713_v0 }
 0x886   : > { %2412 = vmatpush3.msra.mxu0 %v3257_v6 }
 0x887   : > { %2413 = vmatprep.subr.mxu0 %v2713_v0 }
 0x888   : > { %2414 = vmatpush3.msra.mxu0 %v3263_v7 }
 0x889   : > { %2415 = vmatprep.subr.mxu0 %v2713_v0 }
 0x88a   : > { %2416 = vmatpush3.msra.mxu0 %v3267_v8 }
 0x88b   : > { %2417 = vmatprep.subr.mxu0 %v2713_v0 }
 0x88c   : > { %2418 = vmatpush3.msra.mxu0 %v3271_v9 }
 0x88d   : > { %2419 = vmatprep.subr.mxu0 %v2713_v0 }
 0x88e   : > { %2420 = vmatpush3.msra.mxu0 %v3275_v10 }
 0x88f   : > { %2421 = vmatprep.subr.mxu0 %v2713_v0 }
 0x890   : > { %2422 = vmatpush3.msra.mxu0 %v3279_v11 }
 0x891   : > { %2423 = vmatprep.subr.mxu0 %v2713_v0 }
 0x892   : > { %2424 = vmatpush3.msra.mxu0 %v3283_v12 }
 0x893   : > { %2425 = vmatprep.subr.mxu0 %v2713_v0 }
 0x894   : > { %2426 = vmatpush3.msra.mxu0 %v3287_v13 }
 0x895   : > { %2427 = vmatprep.subr.mxu0 %v2713_v0 }
 0x896   : > { %2428 = vmatpush3.msra.mxu0 %v3291_v14 }
 0x897   : > { %2429 = vmatprep.subr.mxu0 %v2713_v0 }
 0x898   : > { %2430 = vmatpush3.msra.mxu0 %v3295_v15 }
 0x899   : > { %2431 = vmatprep.subr.mxu0 %v2713_v0 }
 0x89a   : > { %2432 = vmatpush3.msra.mxu0 %v3299_v16 }
 0x89b   : > { %2433 = vmatprep.subr.mxu0 %v2713_v0 }
 0x89c   : > { %2434 = vmatpush3.msra.mxu0 %v3303_v17 }
 0x89d   : > { %2435 = vmatprep.subr.mxu0 %v2713_v0 }
 0x89e   : > { %2436 = vmatpush3.msra.mxu0 %v3307_v18 }
 0x89f   : > { %2437 = vmatprep.subr.mxu0 %v2713_v0 }
 0x8a0   : > { %2438 = vmatpush3.msra.mxu0 %v3311_v19 }
 0x8a1   : > { %2439 = vmatprep.subr.mxu0 %v2713_v0 }
 0x8a2   : > { %2440 = vmatpush3.msra.mxu0 %v3315_v20 }
 0x943   : > { %v1299_v3 = vpop.f32.mrf.mxu0 }
 0x944   : > { %v1300_v5 = vadd.f32 %v3407_v41, %v1299_v3 }
 0x945   : > { %v2373_v6 = vpop.f32.mrf.mxu0 }
 0x946   : > { %v1303_v7 = vmax.f32 %v1300_v5, 0.0 }
 0x948   : > { %2407 = vmatmul.mubr.f32.vlgmr.msra.gmra.mxu1 %v1303_v7 }
 0x949   : > { %2445 = vmatpush3.msra.mxu1 %v3357_v25  ;;  %2476 = vmatprep.mubr.msk.f32.mxu1 %vm2714_vm0, %v2713_v0 }
 0x94a   : > { %2446 = vmatprep.subr.mxu1 %v2713_v0 }
 0x94b   : > { %2447 = vmatpush3.msra.mxu1 %v3359_v27 }
 0x94c   : > { %2448 = vmatprep.subr.mxu1 %v2713_v0 }
 0x94d   : > { %2449 = vmatpush3.msra.mxu1 %v3365_v28 }
 0x94e   : > { %2450 = vmatprep.subr.mxu1 %v2713_v0 }
 0x94f   : > { %2451 = vmatpush3.msra.mxu1 %v3369_v29 }
 0x950   : > { %2452 = vmatprep.subr.mxu1 %v2713_v0 }
 0x951   : > { %2453 = vmatpush3.msra.mxu1 %v3373_v30 }
 0x952   : > { %2454 = vmatprep.subr.mxu1 %v2713_v0 }
 0x953   : > { %2455 = vmatpush3.msra.mxu1 %v3377_v31 }
 0x954   : > { %2456 = vmatprep.subr.mxu1 %v2713_v0 }
 0x955   : > { %2457 = vmatpush3.msra.mxu1 %v3381_v32 }
 0x956   : > { %2458 = vmatprep.subr.mxu1 %v2713_v0 }
 0x957   : > { %2459 = vmatpush3.msra.mxu1 %v3385_v33 }
 0x958   : > { %2460 = vmatprep.subr.mxu1 %v2713_v0 }
 0x959   : > { %2461 = vmatpush3.msra.mxu1 %v3389_v34 }
 0x95a   : > { %2462 = vmatprep.subr.mxu1 %v2713_v0 }
 0x95b   : > { %2463 = vmatpush3.msra.mxu1 %v3393_v36 }
 0x95c   : > { %2464 = vmatprep.subr.mxu1 %v2713_v0 }
 0x95d   : > { %2465 = vmatpush3.msra.mxu1 %v3397_v38 }
 0x95e   : > { %2466 = vmatprep.subr.mxu1 %v2713_v0 }
 0x95f   : > { %2467 = vmatpush3.msra.mxu1 %v3401_v39 }
 0x960   : > { %2468 = vmatprep.subr.mxu1 %v2713_v0 }
 0x961   : > { %2469 = vmatpush3.msra.mxu1 %v3410_v42 }
 0x962   : > { %2470 = vmatprep.subr.mxu1 %v2713_v0 }
 0x963   : > { %2471 = vmatpush3.msra.mxu1 %v3415_v45 }
 0x964   : > { %2472 = vmatprep.subr.mxu1 %v2713_v0 }
 0x965   : > { %2473 = vmatpush3.msra.mxu1 %v3419_v47 }
 0x966   : > { %2474 = vmatprep.subr.mxu1 %v2713_v0  ;;  %v890_v0 = vmul.f32 0.25, %v3463_v50 }
 0x967   : > { %2475 = vmatpush3.msra.mxu1 %v3423_v49 }
 0x968   : > { %v891_v18 = vadd.f32 %v890_v0, %v3252_v4 }
 0x96a   : > { %v892_v22 = vadd.f32 %v891_v18, %v3100_v46 }
 0xa08   : > { %v1370_v8 = vpop.f32.mrf.mxu1 }
 0xa09   : > { %v1374_v9 = vmul.f32 0.25, %v1370_v8 }
 0xa0a   : > { %v2408_v10 = vpop.f32.mrf.mxu1 }
 0xa0b   : > { %v1375_v11 = vadd.f32 %v1374_v9, %v3548_v2 }
 0xa0d   : > { %v1376_v12 = vadd.f32 %v1375_v11, %v3470_v56 }
 0xa0f   : > { %2442 = vmatmul.mubr.f32.vlgmr.msra.gmra.mxu0 %v1376_v12 }
 0xacf   : > { %v1443_v13 = vpop.f32.mrf.mxu0 }
 0xad0   : > { %v1444_v14 = vadd.f32 %v3407_v41, %v1443_v13 }
 0xad1   : > { %v2443_v15 = vpop.f32.mrf.mxu0 }
 0xad2   : > { %v1447_v16 = vmax.f32 %v1444_v14, 0.0 }
 0xad4   : > { %2477 = vmatmul.mubr.f32.vlgmr.msra.gmra.mxu1 %v1447_v16 }
 0xb94   : > { %v1514_v17 = vpop.f32.mrf.mxu1 }
 0xb95   : > { %v1518_v19 = vmul.f32 0.25, %v1514_v17 }
 0xb96   : > { %v2478_v20 = vpop.f32.mrf.mxu1 }
 0xb97   : > { %v1519_v21 = vadd.f32 %v1518_v19, %v1376_v12 }
 0xb99   : > { %v1520_v23 = vadd.f32 %v1519_v21, %v3470_v56 }
 0xb9b   : > { %v1522_v25 = vadd.f32 %v1520_v23, %v892_v22 }
 0xb9d   : > { %1523 = vst [vmem:[%s268_s28] sm:$0xff] %v1522_v25 }
 0xb9e   : > { %2651 = shalt.err (!%p2648_p9)
}
 0xb9f   : > { %s2652_s10 = scalar_lea.hbm %s1536_s17, 128  ;;  %s2656_s12 = scalar_lea.hbm %s3667_s5, 256 }
 0xba0   : > { %p2653_p13 = scmp.ne.s32.totalorder %s1536_s17, %s2652_s10  ;;  %p2657_p4 = scmp.lt.s32.totalorder %s1536_s17, %s3667_s5 }
 0xba1   : > { %p2658_p8 = scmp.lt.s32.totalorder %s2656_s12, %s2652_s10 }
 0xba2   : > { %p2654_p5 = pnand %p2653_p13, %p3683_p0 }
 0xba3   : > { %p2659_p3 = por %p2658_p8, %p2657_p4 }
 0xba4   : > { %p2655_p10 = pneg %p2654_p5 }
 0xba6   : > { %p2660_p11 = pnand %p2659_p3, %p2655_p10 }
 0xba8   : > { %2663 = shalt.err (!%p2660_p11)
}
 0xba9   : > { %2489 = dma.vmem_to_hbm [thread:$0]  (%p3683_p0), %s1539_s7, 128, %s1536_s17, %s1525_s24  }
 0xbaa PF: > { %s1550_s6 = sand.u32 1, %s2694_s18   ;;  %p3684_p1 = scmp.ne.s32.totalorder %s3673_s25, 0 }
 0xbab   : > { %p3685_p2 = scmp.ge.s32.totalorder %s2706_s21, 2  ;;  %s1551_s28 = scalar_lea.sflag [#allocation4], %s1550_s6 }
 0xbad   : > { %p2503_p6 = pnand %p3685_p2, %p3684_p1 }
 0xbaf   : > { %p2504_p12 = pneg %p2503_p6 }
 0xbb1   : > { %2689 = dma.done.wait (%p2504_p12), %s1551_s28, 128  }
 0xbb2   : > { %2691 = vsyncadd (%p2504_p12), %s1551_s28, 4294967168  ;;  %p19_p7 = scmp.ge.s32.totalorder %s2818_s15, 4   ;;  %s3686_s18 = smov %s2698_s19 }
 0xbb3   : > { %s3687_s19 = smov %s2702_s20  ;;  %s3688_s20 = smov %s2834_s27 }
 0xbb4   : > { %s3689_s21 = smov %s2818_s15  ;;  %21 = sbr.rel (!%p19_p7) target bundleno = 6 (0x6), region = 97 }
 0xbb9   :  { %1556 = vsyncpa [#allocation3], 1 }
 0xbba   :  { %1558 = vsyncpa [#allocation3 + $0x1], 1 }
 0xbbb   :  { %1559 = vsyncpa [#allocation6], 1 }
 0xbbc   :  { %1560 = vsyncpa [#allocation4], 1 }
 0xbbd   :  { %1562 = vsyncpa [#allocation4 + $0x1], 1 }

</bundles_post_ra>
